<compile_context>
chip_gen: v6e
topology: v6e:2x2x1
jax: 0.10.0
libtpu: 0.0.40
codegen_flags: <defaults>
</compile_context>

<pallas_src>
import math

import numpy as np

import jax
import jax.numpy as jnp
from jax.experimental import pallas as pl
from jax.experimental.pallas import tpu as pltpu

NUM_LOGITS = 32
EMBED_DIM = 64
NUM_HEADS = 8                       # module default 10 is invalid (64 % 10 != 0)
HEAD_DIM = EMBED_DIM // NUM_HEADS
SEQ = 8
BATCH = 2

NL = SEQ * BATCH                    # tokens of one module forward ("problem") = 16
R = NUM_HEADS * NL                  # lane-packed (head, key-token) axis = 128
PROBLEMS_PER_BLOCK = 8              # problems fused per grid step
ROWS = PROBLEMS_PER_BLOCK * NL      # 128 token rows per grid step
NEG_INF = -1e30


def _simple_attention_kernel(x_ref, wqkv_ref, bqkv_ref, hm_ref, amask_ref,
                             seg_ref, wsh_ref, bscore_ref, out_ref):
    E, H, BP = EMBED_DIM, NUM_HEADS, PROBLEMS_PER_BLOCK

    # ---- fused q/k/v projection + MHA in_proj (q-scale folded): one push -----
    qkv = jnp.dot(x_ref[...], wqkv_ref[...],
                  preferred_element_type=jnp.float32) + bqkv_ref[...]   # (ROWS, 3E)
    q = qkv[:, :E].reshape(BP, NL, E)            # already * 1/sqrt(Dh)
    k = qkv[:, E:2 * E].reshape(BP, NL, E)
    v = qkv[:, 2 * E:].reshape(BP, NL, E)

    # ---- lane-packed (head, key) axis: replicate K/V along sublanes, zero ----
    # ---- cross-head columns with the precomputed block-diagonal mask ---------
    hm = hm_ref[...]                                                    # (R, E) of {0,1}
    k_big = jnp.concatenate([k] * H, axis=1) * hm                       # (BP, R, E)
    v_big = jnp.concatenate([v] * H, axis=1) * hm                       # (BP, R, E)

    # ---- scores: one lane-dense (NL, R) tile per problem ---------------------
    s = jnp.einsum('pqe,pre->pqr', q, k_big,
                   preferred_element_type=jnp.float32)                  # (BP, NL, R)
    s = s + amask_ref[...]                    # additive 0 / -1e30 same-batch mask

    # ---- one softmax pass: row-global max, per-head denominators via ---------
    # ---- segment-sum matmul, normalization delayed past the scoring fold -----
    m = jnp.max(s, axis=-1, keepdims=True)
    p = jnp.exp(s - m)                                                  # (BP, NL, R)
    denom = jnp.dot(p.reshape(BP * NL, R), seg_ref[...],
                    preferred_element_type=jnp.float32)                 # (ROWS, H)

    # Unnormalized context already lands in concatenated-head column order.
    ctx = jnp.einsum('pqr,pre->pqe', p, v_big,
                     preferred_element_type=jnp.float32)                # (BP, NL, E)

    # out_proj and Linear(E -> 1) folded per head: partial[row, h] is the
    # head-h contribution to the score, still missing its 1/denom factor.
    partial = jnp.dot(ctx.reshape(BP * NL, E), wsh_ref[...],
                      preferred_element_type=jnp.float32)               # (ROWS, H)

    inv = pl.reciprocal(denom, approx=True)   # EUP slot (otherwise idle)
    inv = inv * (2.0 - denom * inv)           # one Newton step -> ~f32 accuracy

    out_ref[...] = (jnp.sum(partial * inv, axis=-1, keepdims=True)
                    + bscore_ref[0])                                    # (ROWS, 1)


def _build_constants():
    """Host-side precompute of the constant masks (feedback: hoist out of kernel)."""
    r = np.arange(R)
    e = np.arange(EMBED_DIM)
    i = np.arange(NL)
    h = np.arange(NUM_HEADS)
    head_mask = (r[:, None] // NL == e[None, :] // HEAD_DIM).astype(np.float32)    # (R, E)
    same_batch = (i[:, None] % BATCH) == ((r[None, :] % NL) % BATCH)
    attn_mask = np.where(same_batch, 0.0, NEG_INF).astype(np.float32)               # (NL, R)
    seg_sum = (r[:, None] // NL == h[None, :]).astype(np.float32)                   # (R, H)
    head_split = (e[:, None] // HEAD_DIM == h[None, :]).astype(np.float32)          # (E, H)
    return head_mask, attn_mask, seg_sum, head_split


def init_params(key):
    """Raw (unfused) parameters mirroring the PyTorch module."""
    ks = jax.random.split(key, 16)

    def w(k, shape, fan_in):
        return jax.random.normal(k, shape, jnp.float32) / math.sqrt(fan_in)

    D, E = NUM_LOGITS, EMBED_DIM
    return dict(
        wq=w(ks[0], (D, E), D),  bq=w(ks[1], (1, E), D),
        wk=w(ks[2], (D, E), D),  bk=w(ks[3], (1, E), D),
        wv=w(ks[4], (D, E), D),  bv=w(ks[5], (1, E), D),
        wiq=w(ks[6], (E, E), E), biq=w(ks[7], (1, E), E),
        wik=w(ks[8], (E, E), E), bik=w(ks[9], (1, E), E),
        wiv=w(ks[10], (E, E), E), biv=w(ks[11], (1, E), E),
        wo=w(ks[12], (E, E), E),  bo=w(ks[13], (1, E), E),
        wl=w(ks[14], (E, 1), E),  bl=w(ks[15], (1, 1), E),
    )


def fuse_params(params):
    """One-time algebraic folding of the stacked linear stages (host side)."""
    scale = 1.0 / math.sqrt(HEAD_DIM)
    wq_eff = (params["wq"] @ params["wiq"]) * scale
    bq_eff = (params["bq"] @ params["wiq"] + params["biq"]) * scale
    wk_eff = params["wk"] @ params["wik"]
    bk_eff = params["bk"] @ params["wik"] + params["bik"]
    wv_eff = params["wv"] @ params["wiv"]
    bv_eff = params["bv"] @ params["wiv"] + params["biv"]
    w_score = params["wo"] @ params["wl"]                     # (E, 1)
    b_score = params["bo"] @ params["wl"] + params["bl"]      # (1, 1)

    head_mask, attn_mask, seg_sum, head_split = _build_constants()
    return dict(
        w_qkv=jnp.concatenate([wq_eff, wk_eff, wv_eff], axis=1),   # (Din, 3E)
        b_qkv=jnp.concatenate([bq_eff, bk_eff, bv_eff], axis=1),   # (1, 3E)
        w_score_h=w_score * jnp.asarray(head_split),               # (E, H) head-split scoring
        b_score=jnp.reshape(b_score, (1,)),                        # (1,) scalar -> SMEM
        head_mask=jnp.asarray(head_mask),                          # (R, E)
        attn_mask=jnp.asarray(attn_mask),                          # (NL, R)
        seg_sum=jnp.asarray(seg_sum),                              # (R, H)
    )


@jax.jit
def simple_attention_forward_batched(logits_stack, fused):
    """logits_stack: (P, L, N, num_logits) -- P independent module forwards."""
    P, L, N, Din = logits_stack.shape
    assert (L, N, Din) == (SEQ, BATCH, NUM_LOGITS)

    x = logits_stack.reshape(P * NL, Din)          # row t = l*N + n within each problem
    p_pad = -(-P // PROBLEMS_PER_BLOCK) * PROBLEMS_PER_BLOCK
    if p_pad != P:
        x = jnp.pad(x, ((0, (p_pad - P) * NL), (0, 0)))
    num_blocks = p_pad // PROBLEMS_PER_BLOCK

    flops = num_blocks * 2 * (
        ROWS * Din * 3 * EMBED_DIM                      # fused projection
        + PROBLEMS_PER_BLOCK * NL * EMBED_DIM * R       # scores
        + PROBLEMS_PER_BLOCK * NL * R * EMBED_DIM       # context
        + ROWS * R * NUM_HEADS                          # per-head denominators
        + ROWS * EMBED_DIM * NUM_HEADS)                 # folded scoring head
    transcendentals = num_blocks * ROWS * (R + NUM_HEADS)
    bytes_accessed = 4 * (x.size + p_pad * NL
                          + fused["w_qkv"].size + fused["b_qkv"].size
                          + fused["head_mask"].size + fused["attn_mask"].size
                          + fused["seg_sum"].size + fused["w_score_h"].size + 1)

    scr = pl.pallas_call(
        _simple_attention_kernel,
        out_shape=jax.ShapeDtypeStruct((p_pad * NL, 1), jnp.float32),
        grid=(num_blocks,),
        in_specs=[
            pl.BlockSpec((ROWS, NUM_LOGITS), lambda i: (i, 0)),           # x (streamed)
            pl.BlockSpec((NUM_LOGITS, 3 * EMBED_DIM), lambda i: (0, 0)),  # fused proj W
            pl.BlockSpec((1, 3 * EMBED_DIM), lambda i: (0, 0)),           # fused proj b
            pl.BlockSpec((R, EMBED_DIM), lambda i: (0, 0)),               # head block-diag mask
            pl.BlockSpec((NL, R), lambda i: (0, 0)),                      # same-batch additive mask
            pl.BlockSpec((R, NUM_HEADS), lambda i: (0, 0)),               # segment-sum matrix
            pl.BlockSpec((EMBED_DIM, NUM_HEADS), lambda i: (0, 0)),       # head-split scoring W
            pl.BlockSpec(memory_space=pltpu.MemorySpace.SMEM),            # scalar score bias
        ],
        out_specs=pl.BlockSpec((ROWS, 1), lambda i: (i, 0)),
        compiler_params=pltpu.CompilerParams(
            dimension_semantics=("parallel",)),          # v7x: shard grid over both TCs
        cost_estimate=pl.CostEstimate(flops=flops,
                                      transcendentals=transcendentals,
                                      bytes_accessed=bytes_accessed),
    )(x, fused["w_qkv"], fused["b_qkv"], fused["head_mask"], fused["attn_mask"],
      fused["seg_sum"], fused["w_score_h"], fused["b_score"])

    return scr[:P * NL].reshape(P, L, N, 1)


def simple_attention_forward(logits, fused):
    """logits: (L, N, num_logits), seq-first like the PyTorch module -> (L, N, 1)."""
    return simple_attention_forward_batched(logits[None], fused)[0]


def simple_attention_reference(logits, params):
    """Pure-JAX reference of the original (unfused) forward pass."""
    x = jnp.transpose(logits, (1, 0, 2))     # (N, L, Din)
    q = x @ params["wq"] + params["bq"][0]
    k = x @ params["wk"] + params["bk"][0]
    v = x @ params["wv"] + params["bv"][0]
    qi = q @ params["wiq"] + params["biq"][0]
    ki = k @ params["wik"] + params["bik"][0]
    vi = v @ params["wiv"] + params["biv"][0]
    N, L, E = qi.shape
    qh = qi.reshape(N, L, NUM_HEADS, HEAD_DIM).transpose(0, 2, 1, 3)
    kh = ki.reshape(N, L, NUM_HEADS, HEAD_DIM).transpose(0, 2, 1, 3)
    vh = vi.reshape(N, L, NUM_HEADS, HEAD_DIM).transpose(0, 2, 1, 3)
    s = jnp.einsum("nhqd,nhkd->nhqk", qh, kh) / math.sqrt(HEAD_DIM)
    p = jax.nn.softmax(s, axis=-1)
    ctx = jnp.einsum("nhqk,nhkd->nhqd", p, vh)
    ctx = ctx.transpose(0, 2, 1, 3).reshape(N, L, E)
    o = ctx @ params["wo"] + params["bo"][0]
    scr = o @ params["wl"] + params["bl"][0]
    return jnp.transpose(scr, (1, 0, 2))     # (L, N, 1)


if __name__ == "__main__":
    key = jax.random.PRNGKey(0)
    k_in, k_par = jax.random.split(key)
    params = init_params(k_par)
    fused = fuse_params(params)              # one-time f32 weight folding + const masks

    # 64 independent module forwards, each (L=8, N=2, num_logits=32), in one call.
    P = 64
    logits_stack = jax.random.normal(k_in, (P, SEQ, BATCH, NUM_LOGITS), jnp.float32)

    out = simple_attention_forward_batched(logits_stack, fused)
    out = jax.block_until_ready(out)
    assert out.shape == (P, SEQ, BATCH, 1), out.shape

    ref = jax.vmap(lambda lg: simple_attention_reference(lg, params))(logits_stack)
    err = float(jnp.max(jnp.abs(out - ref)))
    assert jnp.allclose(out, ref, atol=5e-4, rtol=5e-4), err

    # Single-problem path (module-equivalent signature); exercises problem padding.
    single = simple_attention_forward(logits_stack[0], fused)
    single = jax.block_until_ready(single)
    assert single.shape == (SEQ, BATCH, 1), single.shape
    assert jnp.allclose(single, ref[0], atol=5e-4, rtol=5e-4)

    print("KERNEL_OK")
</pallas_src>

<mosaic_0001>
module attributes {stable_mosaic.version = 11 : i64} {
  func.func @_simple_attention_kernel(%arg0: i32, %arg1: memref<128x32xf32, #tpu.memory_space<vmem>>, %arg2: memref<32x192xf32, #tpu.memory_space<vmem>>, %arg3: memref<1x192xf32, #tpu.memory_space<vmem>>, %arg4: memref<128x64xf32, #tpu.memory_space<vmem>>, %arg5: memref<16x128xf32, #tpu.memory_space<vmem>>, %arg6: memref<128x8xf32, #tpu.memory_space<vmem>>, %arg7: memref<64x8xf32, #tpu.memory_space<vmem>>, %arg8: memref<1xf32, #tpu.memory_space<smem>>, %arg9: memref<128x1xf32, #tpu.memory_space<vmem>>) attributes {dimension_semantics = [#tpu.dimension_semantics<parallel>], iteration_bounds = array<i64: 8>, scalar_prefetch = 0 : i64, scratch_operands = 0 : i64, tpu.core_type = #tpu.core_type<tc>, window_params = [{transform_indices = @transform_0, window_bounds = array<i64: 128, 32>}, {pipeline_mode = #tpu.pipeline_mode<synchronous>, transform_indices = @transform_1, window_bounds = array<i64: 32, 192>}, {pipeline_mode = #tpu.pipeline_mode<synchronous>, transform_indices = @transform_2, window_bounds = array<i64: 1, 192>}, {pipeline_mode = #tpu.pipeline_mode<synchronous>, transform_indices = @transform_3, window_bounds = array<i64: 128, 64>}, {pipeline_mode = #tpu.pipeline_mode<synchronous>, transform_indices = @transform_4, window_bounds = array<i64: 16, 128>}, {pipeline_mode = #tpu.pipeline_mode<synchronous>, transform_indices = @transform_5, window_bounds = array<i64: 128, 8>}, {pipeline_mode = #tpu.pipeline_mode<synchronous>, transform_indices = @transform_6, window_bounds = array<i64: 64, 8>}, {transform_indices = @transform_7, window_bounds = array<i64: 1>}, {transform_indices = @transform_8, window_bounds = array<i64: 128, 1>}]} {
    %c0 = arith.constant 0 : index
    %c0_0 = arith.constant 0 : index
    %0 = vector.load %arg1[%c0, %c0_0] : memref<128x32xf32, #tpu.memory_space<vmem>>, vector<128x32xf32>
    %c0_1 = arith.constant 0 : index
    %c0_2 = arith.constant 0 : index
    %1 = vector.load %arg2[%c0_1, %c0_2] : memref<32x192xf32, #tpu.memory_space<vmem>>, vector<32x192xf32>
    %cst = arith.constant dense<0.000000e+00> : vector<128x192xf32>
    %2 = tpu.matmul %0, %1, %cst {dimension_numbers = #tpu.dot_dimension_numbers<[1], [0], [0], [1], [0, 0, 1, 1], [], []>} : vector<128x32xf32>, vector<32x192xf32>, vector<128x192xf32> -> vector<128x192xf32>
    %c0_3 = arith.constant 0 : index
    %c0_4 = arith.constant 0 : index
    %3 = vector.load %arg3[%c0_3, %c0_4] : memref<1x192xf32, #tpu.memory_space<vmem>>, vector<1x192xf32>
    %4 = vector.broadcast %3 : vector<1x192xf32> to vector<128x192xf32>
    %5 = arith.addf %2, %4 : vector<128x192xf32>
    %6 = vector.extract_strided_slice %5 {offsets = [0, 0], sizes = [128, 64], strides = [1, 1]} : vector<128x192xf32> to vector<128x64xf32>
    %7 = vector.shape_cast %6 : vector<128x64xf32> to vector<8x16x64xf32>
    %8 = vector.extract_strided_slice %5 {offsets = [0, 64], sizes = [128, 64], strides = [1, 1]} : vector<128x192xf32> to vector<128x64xf32>
    %9 = vector.shape_cast %8 : vector<128x64xf32> to vector<8x16x64xf32>
    %10 = vector.extract_strided_slice %5 {offsets = [0, 128], sizes = [128, 64], strides = [1, 1]} : vector<128x192xf32> to vector<128x64xf32>
    %11 = vector.shape_cast %10 : vector<128x64xf32> to vector<8x16x64xf32>
    %c0_5 = arith.constant 0 : index
    %c0_6 = arith.constant 0 : index
    %12 = vector.load %arg4[%c0_5, %c0_6] : memref<128x64xf32, #tpu.memory_space<vmem>>, vector<128x64xf32>
    %13 = tpu.concatenate %9, %9, %9, %9, %9, %9, %9, %9 in 1 : vector<8x16x64xf32>, vector<8x16x64xf32>, vector<8x16x64xf32>, vector<8x16x64xf32>, vector<8x16x64xf32>, vector<8x16x64xf32>, vector<8x16x64xf32>, vector<8x16x64xf32> -> vector<8x128x64xf32>
    %14 = vector.shape_cast %12 : vector<128x64xf32> to vector<1x128x64xf32>
    %15 = vector.broadcast %14 : vector<1x128x64xf32> to vector<8x128x64xf32>
    %16 = arith.mulf %13, %15 : vector<8x128x64xf32>
    %17 = tpu.concatenate %11, %11, %11, %11, %11, %11, %11, %11 in 1 : vector<8x16x64xf32>, vector<8x16x64xf32>, vector<8x16x64xf32>, vector<8x16x64xf32>, vector<8x16x64xf32>, vector<8x16x64xf32>, vector<8x16x64xf32>, vector<8x16x64xf32> -> vector<8x128x64xf32>
    %18 = vector.shape_cast %12 : vector<128x64xf32> to vector<1x128x64xf32>
    %19 = vector.broadcast %18 : vector<1x128x64xf32> to vector<8x128x64xf32>
    %20 = arith.mulf %17, %19 : vector<8x128x64xf32>
    "tpu.trace_start"() <{level = 10 : i32, message = "pqe,pre->pqr"}> : () -> ()
    %cst_7 = arith.constant dense<0.000000e+00> : vector<8x16x128xf32>
    %21 = tpu.matmul %7, %16, %cst_7 {dimension_numbers = #tpu.dot_dimension_numbers<[2], [2], [1], [1], [0, 0, 0, 1, 1, 1], [0], [0]>} : vector<8x16x64xf32>, vector<8x128x64xf32>, vector<8x16x128xf32> -> vector<8x16x128xf32>
    "tpu.trace_stop"() : () -> ()
    %c0_8 = arith.constant 0 : index
    %c0_9 = arith.constant 0 : index
    %22 = vector.load %arg5[%c0_8, %c0_9] : memref<16x128xf32, #tpu.memory_space<vmem>>, vector<16x128xf32>
    %23 = vector.shape_cast %22 : vector<16x128xf32> to vector<1x16x128xf32>
    %24 = vector.broadcast %23 : vector<1x16x128xf32> to vector<8x16x128xf32>
    %25 = arith.addf %21, %24 : vector<8x16x128xf32>
    %cst_10 = arith.constant dense<0xFF800000> : vector<8x16xf32>
    %26 = vector.multi_reduction <maximumf>, %25, %cst_10 [2] : vector<8x16x128xf32> to vector<8x16xf32>
    %27 = vector.shape_cast %26 : vector<8x16xf32> to vector<8x16x1xf32>
    %28 = vector.broadcast %27 : vector<8x16x1xf32> to vector<8x16x128xf32>
    %29 = arith.subf %25, %28 : vector<8x16x128xf32>
    %30 = math.exp %29 : vector<8x16x128xf32>
    %31 = vector.shape_cast %30 : vector<8x16x128xf32> to vector<128x128xf32>
    %c0_11 = arith.constant 0 : index
    %c0_12 = arith.constant 0 : index
    %32 = vector.load %arg6[%c0_11, %c0_12] : memref<128x8xf32, #tpu.memory_space<vmem>>, vector<128x8xf32>
    %cst_13 = arith.constant dense<0.000000e+00> : vector<128x8xf32>
    %33 = tpu.matmul %31, %32, %cst_13 {dimension_numbers = #tpu.dot_dimension_numbers<[1], [0], [0], [1], [0, 0, 1, 1], [], []>} : vector<128x128xf32>, vector<128x8xf32>, vector<128x8xf32> -> vector<128x8xf32>
    "tpu.trace_start"() <{level = 10 : i32, message = "pqr,pre->pqe"}> : () -> ()
    %cst_14 = arith.constant dense<0.000000e+00> : vector<8x16x64xf32>
    %34 = tpu.matmul %30, %20, %cst_14 {dimension_numbers = #tpu.dot_dimension_numbers<[2], [1], [1], [2], [0, 0, 0, 1, 1, 2], [0], [0]>} : vector<8x16x128xf32>, vector<8x128x64xf32>, vector<8x16x64xf32> -> vector<8x16x64xf32>
    "tpu.trace_stop"() : () -> ()
    %35 = vector.shape_cast %34 : vector<8x16x64xf32> to vector<128x64xf32>
    %c0_15 = arith.constant 0 : index
    %c0_16 = arith.constant 0 : index
    %36 = vector.load %arg7[%c0_15, %c0_16] : memref<64x8xf32, #tpu.memory_space<vmem>>, vector<64x8xf32>
    %cst_17 = arith.constant dense<0.000000e+00> : vector<128x8xf32>
    %37 = tpu.matmul %35, %36, %cst_17 {dimension_numbers = #tpu.dot_dimension_numbers<[1], [0], [0], [1], [0, 0, 1, 1], [], []>} : vector<128x64xf32>, vector<64x8xf32>, vector<128x8xf32> -> vector<128x8xf32>
    %38 = tpu.reciprocal %33 {approx = true} : vector<128x8xf32> -> vector<128x8xf32>
    %39 = arith.mulf %33, %38 : vector<128x8xf32>
    %cst_18 = arith.constant 2.000000e+00 : f32
    %40 = vector.broadcast %cst_18 : f32 to vector<128x8xf32>
    %41 = arith.subf %40, %39 : vector<128x8xf32>
    %42 = arith.mulf %38, %41 : vector<128x8xf32>
    %43 = arith.mulf %37, %42 : vector<128x8xf32>
    %cst_19 = arith.constant dense<0.000000e+00> : vector<128xf32>
    %44 = vector.multi_reduction <add>, %43, %cst_19 [1] : vector<128x8xf32> to vector<128xf32>
    %45 = vector.shape_cast %44 : vector<128xf32> to vector<128x1xf32>
    %c0_20 = arith.constant 0 : index
    %46 = memref.load %arg8[%c0_20] : memref<1xf32, #tpu.memory_space<smem>>
    %47 = vector.broadcast %46 : f32 to vector<128x1xf32>
    %48 = arith.addf %45, %47 : vector<128x1xf32>
    %c0_21 = arith.constant 0 : index
    %c0_22 = arith.constant 0 : index
    %49 = vector.load %arg9[%c0_21, %c0_22] : memref<128x1xf32, #tpu.memory_space<vmem>>, vector<128x1xf32>
    tpu.vector_store %arg9[%c0_21, %c0_22], %48 {strides = array<i32>} : memref<128x1xf32, #tpu.memory_space<vmem>>, vector<128x1xf32>,
    return
  }
  func.func @transform_0(%arg0: i32) -> (i32, i32) {
    %c0_i32 = arith.constant 0 : i32
    %c0_i32_0 = arith.constant 0 : i32
    return %arg0, %c0_i32 : i32, i32
  }
  func.func @transform_1(%arg0: i32) -> (i32, i32) {
    %c0_i32 = arith.constant 0 : i32
    %c0_i32_0 = arith.constant 0 : i32
    %c0_i32_1 = arith.constant 0 : i32
    return %c0_i32, %c0_i32_0 : i32, i32
  }
  func.func @transform_2(%arg0: i32) -> (i32, i32) {
    %c0_i32 = arith.constant 0 : i32
    %c0_i32_0 = arith.constant 0 : i32
    %c0_i32_1 = arith.constant 0 : i32
    return %c0_i32, %c0_i32_0 : i32, i32
  }
  func.func @transform_3(%arg0: i32) -> (i32, i32) {
    %c0_i32 = arith.constant 0 : i32
    %c0_i32_0 = arith.constant 0 : i32
    %c0_i32_1 = arith.constant 0 : i32
    return %c0_i32, %c0_i32_0 : i32, i32
  }
  func.func @transform_4(%arg0: i32) -> (i32, i32) {
    %c0_i32 = arith.constant 0 : i32
    %c0_i32_0 = arith.constant 0 : i32
    %c0_i32_1 = arith.constant 0 : i32
    return %c0_i32, %c0_i32_0 : i32, i32
  }
  func.func @transform_5(%arg0: i32) -> (i32, i32) {
    %c0_i32 = arith.constant 0 : i32
    %c0_i32_0 = arith.constant 0 : i32
    %c0_i32_1 = arith.constant 0 : i32
    return %c0_i32, %c0_i32_0 : i32, i32
  }
  func.func @transform_6(%arg0: i32) -> (i32, i32) {
    %c0_i32 = arith.constant 0 : i32
    %c0_i32_0 = arith.constant 0 : i32
    %c0_i32_1 = arith.constant 0 : i32
    return %c0_i32, %c0_i32_0 : i32, i32
  }
  func.func @transform_7(%arg0: i32) -> i32 {
    %c0_i32 = arith.constant 0 : i32
    %c0_i32_0 = arith.constant 0 : i32
    return %c0_i32 : i32
  }
  func.func @transform_8(%arg0: i32) -> (i32, i32) {
    %c0_i32 = arith.constant 0 : i32
    %c0_i32_0 = arith.constant 0 : i32
    return %arg0, %c0_i32 : i32, i32
  }
}

</mosaic_0001>

<bundles_post_ra>
// kernel: simple_attention_forward_batched.1
= control target key start
LH: loop header
LB: loop body
LE: loop exit
PB: predicated region body
PF: predicated region fallthrough
CT: control target
= control target key end

     0   :  { %s4796_s29 = smov 0   ;;  %s6481_s0 = inlined_call_operand.vmem [shape: f32[1024,32], index: 0, kind: input, shape index: {}]   ;;  %s6482_s1 = inlined_call_operand.vmem [shape: f32[32,192], index: 1, kind: input, shape index: {}]   ;;  %s6483_s2 = inlined_call_operand.vmem [shape: f32[1,192], index: 2, kind: input, shape index: {}]   ;;  %s6484_s3 = inlined_call_operand.vmem [shape: f32[128,64], index: 3, kind: input, shape index: {}]   ;;  %s6485_s4 = inlined_call_operand.vmem [shape: f32[16,128], index: 4, kind: input, shape index: {}]   ;;  %s6486_s5 = inlined_call_operand.vmem [shape: f32[128,8], index: 5, kind: input, shape index: {}]   ;;  %s6487_s6 = inlined_call_operand.vmem [shape: f32[64,8], index: 6, kind: input, shape index: {}]   ;;  %s6488_s7 = inlined_call_operand.<no memory space> [shape: f32[1], index: 7, kind: input, shape index: {}]   ;;  %s6489_s8 = inlined_call_operand.vmem [shape: f32[1024,1], index: 8, kind: output, shape index: {}]  }
   0x1   :  { %13 = sst [smem:[#allocation2]] %s6488_s7 }
   0x2 LB: > { %s3445_s30 = sadd.s32 4294967295, %s4744_s29   ;;  %p3449_p0 = scmp.ge.s32.totalorder %s4744_s29, 1  ;;  %s4744_s29 = sphi %s4796_s29, %s19_s29  }
   0x3   : > { %p264_p1 = scmp.lt.s32.totalorder %s4744_s29, 9 }
   0x5   : > { %p265_p2 = pnand %p3449_p0, %p264_p1 }
   0x6   : > { %s3450_s14 = sshll.u32 (!%p265_p2), %s3445_s30, 4  ;;  %s4747_s23 = smov (!%p265_p2), 64  }
   0x7   : > { %268 = sbr.rel (%p265_p2) target bundleno = 1592 (0x638), region = 52  ;;  %p299_p3 = scmp.lt.s32.totalorder (!%p265_p2), %s3450_s14, 127 }
   0x8   : > { %s3354_s21 = sld [smem:[#allocation2]] (!%p265_p2) }
   0xc   : > { %v333_v0 = vld [vmem:[%s6482_s1 + $0x38] sm:$0xff]  ;;  %v332_v1 = vld [vmem:[%s6482_s1 + $0x30] sm:$0xff]  ;;  %v331_v2 = vld [vmem:[%s6482_s1 + $0x28] sm:$0xff]  ;;  %v4746_v4 = vmov 0.0   ;;  %s6491_s14 = smov (!%p299_p3, %s3450_s14), 127  ;;  %vm346_vm0 = vcmask 261120   ;;  %v336_v41 = vlaneseq }
   0xd   : > { %419 = vmatprep.subr.mxu1 %v333_v0  ;;  %v330_v3 = vld [vmem:[%s6482_s1 + $0x20] sm:$0xff]  ;;  %459 = vmatprep.mubr.f32.mxu1 %v4746_v4  ;;  %v329_v5 = vld [vmem:[%s6482_s1 + $0x18] sm:$0xff]  ;;  %v569_v6 = vld [vmem:[%s6484_s3 + $0x68] sm:$0xff]  ;;  %s3451_s7 = sshll.u32 %s6491_s14, 3  ;;  %vm942_vm1 = vcmask 523264   ;;  %vm3305_vm2 = vcmask 64512  }
   0xe   : > { %420 = vmatpush1.msra.mxu1 %v332_v1  ;;  %v328_v7 = vld [vmem:[%s6482_s1 + $0x10] sm:$0xff]  ;;  %614 = vrot.lane.b32.xlu1 %v569_v6, %s4747_s23  ;;  %v571_v8 = vld [vmem:[%s6484_s3 + $0x78] sm:$0xff]  ;;  %v327_v9 = vld [vmem:[%s6482_s1 + $0x8] sm:$0xff]  ;;  %s4851_s16 = scalar_lea.vmem %s6481_s0, %s3451_s7  ;;  %v337_v42 = vshrl.u32 %v336_v41, 7  ;;  %s6386_s25 = scalar_lea.vmem %s6489_s8, %s3451_s7  ;;  %vm3372_vm3 = vcmask 7168  }
   0xf   : > { %421 = vmatprep.subr.mxu1 %v331_v2  ;;  %618 = vrot.lane.b32.xlu0 %v571_v8, %s4747_s23  ;;  %v568_v10 = vld [vmem:[%s6484_s3 + $0x60] sm:$0xff]  ;;  %v570_v12 = vld [vmem:[%s6484_s3 + $0x70] sm:$0xff]  ;;  %v567_v15 = vld [vmem:[%s6484_s3 + $0x58] sm:$0xff] }
  0x10   : > { %422 = vmatpush1.msra.mxu1 %v330_v3  ;;  %v326_v11 = vld [vmem:[%s6482_s1] sm:$0xff]  ;;  %v566_v14 = vld [vmem:[%s6484_s3 + $0x50] sm:$0xff]  ;;  %v311_v16 = vld [vmem:[%s4851_s16 + $0x8] sm:$0xff]  ;;  %v342_v43 = vsub.s32 1, %v337_v42  ;;  %v338_v46 = vsub.s32 0, %v337_v42 }
  0x11   : > { %423 = vmatprep.subr.mxu1 %v329_v5  ;;  %v310_v13 = vld [vmem:[%s4851_s16] sm:$0xff]  ;;  %v565_v18 = vld [vmem:[%s6484_s3 + $0x48] sm:$0xff]  ;;  %v312_v19 = vld [vmem:[%s4851_s16 + $0x10] sm:$0xff] }
  0x12   : > { %424 = vmatpush1.msra.mxu1 %v328_v7  ;;  %612 = vrot.lane.b32.xlu1 %v568_v10, %s4747_s23  ;;  %v564_v17 = vld [vmem:[%s6484_s3 + $0x40] sm:$0xff]  ;;  %v562_v20 = vld [vmem:[%s6484_s3 + $0x30] sm:$0xff]  ;;  %v563_v21 = vld [vmem:[%s6484_s3 + $0x38] sm:$0xff] }
  0x13   : > { %425 = vmatprep.subr.mxu1 %v327_v9  ;;  %616 = vrot.lane.b32.xlu0 %v570_v12, %s4747_s23  ;;  %v313_v22 = vld [vmem:[%s4851_s16 + $0x18] sm:$0xff]  ;;  %v560_v23 = vld [vmem:[%s6484_s3 + $0x20] sm:$0xff]  ;;  %v561_v24 = vld [vmem:[%s6484_s3 + $0x28] sm:$0xff] }
  0x14   : > { %426 = vmatpush1.msra.mxu1 %v326_v11  ;;  %v314_v25 = vld [vmem:[%s4851_s16 + $0x20] sm:$0xff]  ;;  %v558_v26 = vld [vmem:[%s6484_s3 + $0x10] sm:$0xff]  ;;  %v559_v27 = vld [vmem:[%s6484_s3 + $0x18] sm:$0xff] }
  0x15   : > { %3454 = vmatmul.mubr.msk.f32.vlgmr.msra.gmra.mxu1 %vm346_vm0, %v310_v13  ;;  %v315_v28 = vld [vmem:[%s4851_s16 + $0x28] sm:$0xff]  ;;  %v556_v29 = vld [vmem:[%s6484_s3] sm:$0xff]  ;;  %v316_v31 = vld [vmem:[%s4851_s16 + $0x30] sm:$0xff] }
  0x16   : > { %465 = vmatprep.mubr.f32.mxu1 %v4746_v4  ;;  %608 = vrot.lane.b32.xlu1 %v566_v14, %s4747_s23  ;;  %v557_v30 = vld [vmem:[%s6484_s3 + $0x8] sm:$0xff]  ;;  %v317_v32 = vld [vmem:[%s4851_s16 + $0x38] sm:$0xff]  ;;  %v318_v33 = vld [vmem:[%s4851_s16 + $0x40] sm:$0xff] }
  0x17   : > { %610 = vrot.lane.b32.xlu0 %v567_v15, %s4747_s23  ;;  %v319_v34 = vld [vmem:[%s4851_s16 + $0x48] sm:$0xff]  ;;  %v320_v35 = vld [vmem:[%s4851_s16 + $0x50] sm:$0xff]  ;;  %v321_v36 = vld [vmem:[%s4851_s16 + $0x58] sm:$0xff] }
  0x18   : > { %v322_v37 = vld [vmem:[%s4851_s16 + $0x60] sm:$0xff]  ;;  %v323_v38 = vld [vmem:[%s4851_s16 + $0x68] sm:$0xff]  ;;  %v324_v39 = vld [vmem:[%s4851_s16 + $0x70] sm:$0xff] }
  0x19   : > { %3455 = vmatmul.mubr.msk.f32.gmra.mxu1 %vm346_vm0, %v311_v16  ;;  %v325_v40 = vld [vmem:[%s4851_s16 + $0x78] sm:$0xff]  ;;  %v334_v44 = vld [vmem:[%s6483_s2] sm:$0x3] }
  0x1a   : > { %471 = vmatprep.mubr.f32.mxu1 %v4746_v4  ;;  %604 = vrot.lane.b32.xlu1 %v564_v17, %s4747_s23  ;;  %v4953_v45 = vrot.slane %v334_v44, %v342_v43  ;;  %v4957_v48 = vrot.slane %v334_v44, %v338_v46 }
  0x1b   : > { %606 = vrot.lane.b32.xlu0 %v565_v18, %s4747_s23 }
  0x1d   : > { %3456 = vmatmul.mubr.msk.f32.gmra.mxu1 %vm346_vm0, %v312_v19 }
  0x1e   : > { %477 = vmatprep.mubr.f32.mxu1 %v4746_v4  ;;  %600 = vrot.lane.b32.xlu1 %v562_v20, %s4747_s23 }
  0x1f   : > { %602 = vrot.lane.b32.xlu0 %v563_v21, %s4747_s23 }
  0x21   : > { %3457 = vmatmul.mubr.msk.f32.gmra.mxu1 %vm346_vm0, %v313_v22 }
  0x22   : > { %483 = vmatprep.mubr.f32.mxu1 %v4746_v4  ;;  %596 = vrot.lane.b32.xlu1 %v560_v23, %s4747_s23 }
  0x23   : > { %598 = vrot.lane.b32.xlu0 %v561_v24, %s4747_s23 }
  0x25   : > { %3458 = vmatmul.mubr.msk.f32.gmra.mxu1 %vm346_vm0, %v314_v25 }
  0x26   : > { %489 = vmatprep.mubr.f32.mxu1 %v4746_v4  ;;  %592 = vrot.lane.b32.xlu1 %v558_v26, %s4747_s23 }
  0x27   : > { %594 = vrot.lane.b32.xlu0 %v559_v27, %s4747_s23 }
  0x29   : > { %3459 = vmatmul.mubr.msk.f32.gmra.mxu1 %vm346_vm0, %v315_v28 }
  0x2a   : > { %495 = vmatprep.mubr.f32.mxu1 %v4746_v4  ;;  %588 = vrot.lane.b32.xlu1 %v556_v29, %s4747_s23 }
  0x2b   : > { %590 = vrot.lane.b32.xlu0 %v557_v30, %s4747_s23 }
  0x2d   : > { %3460 = vmatmul.mubr.msk.f32.gmra.mxu1 %vm346_vm0, %v316_v31 }
  0x2e   : > { %501 = vmatprep.mubr.f32.mxu1 %v4746_v4 }
  0x31   : > { %3461 = vmatmul.mubr.msk.f32.gmra.mxu1 %vm346_vm0, %v317_v32 }
  0x32   : > { %507 = vmatprep.mubr.f32.mxu1 %v4746_v4 }
  0x35   : > { %3462 = vmatmul.mubr.msk.f32.gmra.mxu1 %vm346_vm0, %v318_v33 }
  0x36   : > { %513 = vmatprep.mubr.f32.mxu1 %v4746_v4 }
  0x39   : > { %3463 = vmatmul.mubr.msk.f32.gmra.mxu1 %vm346_vm0, %v319_v34 }
  0x3a   : > { %519 = vmatprep.mubr.f32.mxu1 %v4746_v4 }
  0x3d   : > { %3464 = vmatmul.mubr.msk.f32.gmra.mxu1 %vm346_vm0, %v320_v35 }
  0x3e   : > { %525 = vmatprep.mubr.f32.mxu1 %v4746_v4 }
  0x41   : > { %3465 = vmatmul.mubr.msk.f32.gmra.mxu1 %vm346_vm0, %v321_v36 }
  0x42   : > { %531 = vmatprep.mubr.f32.mxu1 %v4746_v4 }
  0x45   : > { %3466 = vmatmul.mubr.msk.f32.gmra.mxu1 %vm346_vm0, %v322_v37 }
  0x46   : > { %537 = vmatprep.mubr.f32.mxu1 %v4746_v4 }
  0x49   : > { %3467 = vmatmul.mubr.msk.f32.gmra.mxu1 %vm346_vm0, %v323_v38 }
  0x4a   : > { %543 = vmatprep.mubr.f32.mxu1 %v4746_v4 }
  0x4d   : > { %3468 = vmatmul.mubr.msk.f32.gmra.mxu1 %vm346_vm0, %v324_v39 }
  0x4e   : > { %549 = vmatprep.mubr.f32.mxu1 %v4746_v4 }
  0x51   : > { %3469 = vmatmul.mubr.msk.f32.gmra.mxu1 %vm346_vm0, %v325_v40 }
  0x80   : > { %v4970_v54 = vpop.permute.xlu1 %614 }
  0x81   : > { %v4955_v47 = vpop.permute.xlu0 %618 }
  0x84   : > { %v4987_v62 = vpop.permute.xlu1 %612 }
  0x85   : > { %v4962_v51 = vpop.permute.xlu0 %616 }
  0x88   : > { %v5007_v6 = vpop.permute.xlu1 %608 }
  0x89   : > { %v4999_v3 = vpop.permute.xlu0 %610 }
  0x8c   : > { %v5023_v12 = vpop.permute.xlu1 %604 }
  0x8d   : > { %v5015_v9 = vpop.permute.xlu0 %606 }
  0x90   : > { %v5039_v18 = vpop.permute.xlu1 %600 }
  0x91   : > { %v5031_v15 = vpop.permute.xlu0 %602 }
  0x94   : > { %v5055_v24 = vpop.permute.xlu1 %596 }
  0x95   : > { %v5047_v21 = vpop.permute.xlu0 %598 }
  0x98   : > { %v5073_v32 = vpop.permute.xlu1 %592 }
  0x99   : > { %v5065_v28 = vpop.permute.xlu0 %594 }
  0x9c   : > { %v5089_v39 = vpop.permute.xlu1 %588 }
  0x9d   : > { %v5079_v35 = vpop.permute.xlu0 %590 }
  0xd5   : > { %v461_v49 = vpop.f32.mrf.mxu1 }
  0xd6   : > { %v4960_v50 = vadd.f32 %v461_v49, %v4957_v48 }
  0xd7   : > { %v4964_v52 = vpop.f32.mrf.mxu1 }
  0xd8   : > { %4008 = vmatprep.mubr.msk.f32.mxu1 %vm942_vm1, %v4960_v50  ;;  %v650_v53 = vmul.f32 %v4962_v51, %v4960_v50  ;;  %v648_v0 = vmul.f32 %v4987_v62, %v4960_v50  ;;  %v646_v8 = vmul.f32 %v5007_v6, %v4960_v50  ;;  %v644_v14 = vmul.f32 %v5023_v12, %v4960_v50 }
  0xd9   : > { %v467_v55 = vpop.f32.mrf.mxu1  ;;  %v642_v20 = vmul.f32 %v5039_v18, %v4960_v50  ;;  %v640_v26 = vmul.f32 %v5055_v24, %v4960_v50  ;;  %v638_v34 = vmul.f32 %v5073_v32, %v4960_v50  ;;  %v636_v42 = vmul.f32 %v5089_v39, %v4960_v50 }
  0xda   : > { %v4973_v56 = vadd.f32 %v467_v55, %v4957_v48  ;;  %938 = vrot.lane.b32.xlu1 %v650_v53, %s4747_s23 }
  0xdb   : > { %v4976_v57 = vpop.f32.mrf.mxu1 }
  0xdc   : > { %v651_v58 = vmul.f32 %v4955_v47, %v4973_v56  ;;  %v649_v59 = vmul.f32 %v4970_v54, %v4973_v56  ;;  %v647_v5 = vmul.f32 %v4999_v3, %v4973_v56  ;;  %v645_v11 = vmul.f32 %v5015_v9, %v4973_v56 }
  0xdd   : > { %v473_v60 = vpop.f32.mrf.mxu1  ;;  %v643_v17 = vmul.f32 %v5031_v15, %v4973_v56  ;;  %v641_v23 = vmul.f32 %v5047_v21, %v4973_v56  ;;  %v639_v30 = vmul.f32 %v5065_v28, %v4973_v56  ;;  %v637_v38 = vmul.f32 %v5079_v35, %v4973_v56 }
  0xde   : > { %v4983_v61 = vadd.f32 %v473_v60, %v4957_v48  ;;  %940 = vrot.lane.b32.xlu0 %v651_v58, %s4747_s23  ;;  %936 = vrot.lane.b32.xlu1 %v649_v59, %s4747_s23 }
  0xdf   : > { %v4989_v63 = vpop.f32.mrf.mxu1 }
  0xe0   : > { %4043 = vmatprep.mubr.msk.f32.mxu0 %vm942_vm1, %v4983_v61  ;;  %v666_v7 = vmul.f32 %v4962_v51, %v4983_v61  ;;  %v664_v13 = vmul.f32 %v4987_v62, %v4983_v61  ;;  %v662_v19 = vmul.f32 %v5007_v6, %v4983_v61  ;;  %v660_v25 = vmul.f32 %v5023_v12, %v4983_v61 }
  0xe1   : > { %v479_v1 = vpop.f32.mrf.mxu1  ;;  %v658_v33 = vmul.f32 %v5039_v18, %v4983_v61  ;;  %v656_v41 = vmul.f32 %v5055_v24, %v4983_v61  ;;  %v652_v49 = vmul.f32 %v5089_v39, %v4983_v61  ;;  %v654_v55 = vmul.f32 %v5073_v32, %v4983_v61 }
  0xe2   : > { %v4996_v2 = vadd.f32 %v479_v1, %v4957_v48  ;;  %934 = vrot.lane.b32.xlu1 %v648_v0, %s4747_s23 }
  0xe3   : > { %v5061_v27 = vpop.f32.mrf.mxu1 }
  0xe4   : > { %v667_v4 = vmul.f32 %v4955_v47, %v4996_v2  ;;  %v665_v10 = vmul.f32 %v4970_v54, %v4996_v2  ;;  %v663_v16 = vmul.f32 %v4999_v3, %v4996_v2  ;;  %v661_v22 = vmul.f32 %v5015_v9, %v4996_v2 }
  0xe5   : > { %v659_v29 = vmul.f32 %v5031_v15, %v4996_v2  ;;  %v485_v31 = vpop.f32.mrf.mxu1  ;;  %v657_v37 = vmul.f32 %v5047_v21, %v4996_v2  ;;  %v655_v46 = vmul.f32 %v5065_v28, %v4996_v2  ;;  %v653_v60 = vmul.f32 %v5079_v35, %v4996_v2 }
  0xe6   : > { %1102 = vrot.lane.b32.xlu0 %v667_v4, %s4747_s23  ;;  %932 = vrot.lane.b32.xlu1 %v647_v5, %s4747_s23  ;;  %v5102_v44 = vadd.f32 %v485_v31, %v4957_v48 }
  0xe7   : > { %v5081_v36 = vpop.f32.mrf.mxu1 }
  0xe8   : > { %v682_v58 = vmul.f32 %v4962_v51, %v5102_v44  ;;  %v680_v5 = vmul.f32 %v4987_v62, %v5102_v44  ;;  %v672_v31 = vmul.f32 %v5055_v24, %v5102_v44 }
  0xe9   : > { %v491_v40 = vpop.f32.mrf.mxu1 }
  0xea   : > { %1100 = vrot.lane.b32.xlu0 %v666_v7, %s4747_s23  ;;  %930 = vrot.lane.b32.xlu1 %v646_v8, %s4747_s23  ;;  %v5111_v50 = vadd.f32 %v491_v40, %v4957_v48 }
  0xeb   : > { %v5097_v43 = vpop.f32.mrf.mxu1 }
  0xec   : > { %v681_v0 = vmul.f32 %v4970_v54, %v5111_v50  ;;  %v683_v4 = vmul.f32 %v4955_v47, %v5111_v50 }
  0xed   : > { %v497_v53 = vpop.f32.mrf.mxu1 }
  0xee   : > { %1098 = vrot.lane.b32.xlu0 %v665_v10, %s4747_s23  ;;  %928 = vrot.lane.b32.xlu1 %v645_v11, %s4747_s23  ;;  %v5137_v7 = vadd.f32 %v497_v53, %v4957_v48  ;;  %v679_v10 = vmul.f32 %v4999_v3, %v5111_v50  ;;  %v669_v53 = vmul.f32 %v5079_v35, %v5111_v50 }
  0xef   : > { %v5117_v59 = vpop.f32.mrf.mxu1 }
  0xf0   : > { %v698_v11 = vmul.f32 %v4962_v51, %v5137_v7  ;;  %v690_v40 = vmul.f32 %v5039_v18, %v5137_v7 }
  0xf1   : > { %v503_v1 = vpop.f32.mrf.mxu1 }
  0xf2   : > { %1096 = vrot.lane.b32.xlu0 %v664_v13, %s4747_s23  ;;  %926 = vrot.lane.b32.xlu1 %v644_v14, %s4747_s23  ;;  %v5128_v61 = vadd.f32 %v503_v1, %v4957_v48  ;;  %v678_v13 = vmul.f32 %v5007_v6, %v5102_v44 }
  0xf4   : > { %v699_v8 = vmul.f32 %v4955_v47, %v5128_v61  ;;  %v697_v14 = vmul.f32 %v4970_v54, %v5128_v61 }
  0xf6   : > { %1094 = vrot.lane.b32.xlu0 %v663_v16, %s4747_s23  ;;  %924 = vrot.lane.b32.xlu1 %v643_v17, %s4747_s23  ;;  %v677_v16 = vmul.f32 %v5015_v9, %v5111_v50  ;;  %v696_v17 = vmul.f32 %v4987_v62, %v5137_v7 }
  0xfa   : > { %1092 = vrot.lane.b32.xlu0 %v662_v19, %s4747_s23  ;;  %922 = vrot.lane.b32.xlu1 %v642_v20, %s4747_s23  ;;  %v676_v19 = vmul.f32 %v5023_v12, %v5102_v44  ;;  %v695_v20 = vmul.f32 %v4999_v3, %v5128_v61 }
  0xfe   : > { %1090 = vrot.lane.b32.xlu0 %v661_v22, %s4747_s23  ;;  %920 = vrot.lane.b32.xlu1 %v641_v23, %s4747_s23  ;;  %v675_v22 = vmul.f32 %v5031_v15, %v5111_v50  ;;  %v694_v23 = vmul.f32 %v5007_v6, %v5137_v7 }
 0x102   : > { %1088 = vrot.lane.b32.xlu0 %v660_v25, %s4747_s23  ;;  %918 = vrot.lane.b32.xlu1 %v640_v26, %s4747_s23  ;;  %v674_v25 = vmul.f32 %v5039_v18, %v5102_v44  ;;  %v693_v26 = vmul.f32 %v5015_v9, %v5128_v61 }
 0x106   : > { %1086 = vrot.lane.b32.xlu0 %v659_v29, %s4747_s23  ;;  %916 = vrot.lane.b32.xlu1 %v639_v30, %s4747_s23  ;;  %v673_v29 = vmul.f32 %v5047_v21, %v5111_v50  ;;  %v692_v30 = vmul.f32 %v5023_v12, %v5137_v7 }
 0x10a   : > { %1084 = vrot.lane.b32.xlu0 %v658_v33, %s4747_s23  ;;  %914 = vrot.lane.b32.xlu1 %v638_v34, %s4747_s23  ;;  %v5185_v33 = vpop.f32.mrf.mxu1  ;;  %v691_v34 = vmul.f32 %v5031_v15, %v5128_v61 }
 0x10e   : > { %1082 = vrot.lane.b32.xlu0 %v657_v37, %s4747_s23  ;;  %912 = vrot.lane.b32.xlu1 %v637_v38, %s4747_s23  ;;  %v671_v37 = vmul.f32 %v5065_v28, %v5111_v50  ;;  %v509_v38 = vpop.f32.mrf.mxu1 }
 0x112   : > { %1080 = vrot.lane.b32.xlu0 %v656_v41, %s4747_s23  ;;  %910 = vrot.lane.b32.xlu1 %v636_v42, %s4747_s23  ;;  %v670_v41 = vmul.f32 %v5073_v32, %v5102_v44  ;;  %v5199_v42 = vpop.f32.mrf.mxu1 }
 0x116   : > { %1078 = vrot.lane.b32.xlu0 %v655_v46, %s4747_s23  ;;  %1072 = vrot.lane.b32.xlu1 %v652_v49, %s4747_s23  ;;  %v689_v49 = vmul.f32 %v5047_v21, %v5128_v61 }
 0x11a   : > { %1076 = vrot.lane.b32.xlu0 %v654_v55, %s4747_s23  ;;  %1261 = vrot.lane.b32.xlu1 %v682_v58, %s4747_s23  ;;  %v515_v55 = vpop.f32.mrf.mxu1 }
 0x11c   : > { %v5211_v1 = vpop.f32.mrf.mxu1 }
 0x11e   : > { %1074 = vrot.lane.b32.xlu0 %v653_v60, %s4747_s23  ;;  %1259 = vrot.lane.b32.xlu1 %v681_v0, %s4747_s23  ;;  %v688_v0 = vmul.f32 %v5055_v24, %v5137_v7 }
 0x122   : > { %1263 = vrot.lane.b32.xlu0 %v683_v4, %s4747_s23  ;;  %1257 = vrot.lane.b32.xlu1 %v680_v5, %s4747_s23  ;;  %v668_v4 = vmul.f32 %v5089_v39, %v5102_v44 }
 0x126   : > { %1424 = vrot.lane.b32.xlu0 %v699_v8, %s4747_s23  ;;  %1255 = vrot.lane.b32.xlu1 %v679_v10, %s4747_s23  ;;  %v687_v8 = vmul.f32 %v5065_v28, %v5128_v61  ;;  %v5223_v10 = vadd.f32 %v509_v38, %v4957_v48 }
 0x12a   : > { %1422 = vrot.lane.b32.xlu0 %v698_v11, %s4747_s23  ;;  %1253 = vrot.lane.b32.xlu1 %v678_v13, %s4747_s23  ;;  %v521_v11 = vpop.f32.mrf.mxu1  ;;  %v684_v13 = vmul.f32 %v5089_v39, %v5137_v7 }
 0x12e   : > { %1420 = vrot.lane.b32.xlu0 %v697_v14, %s4747_s23  ;;  %1251 = vrot.lane.b32.xlu1 %v677_v16, %s4747_s23 }
 0x132   : > { %1418 = vrot.lane.b32.xlu0 %v696_v17, %s4747_s23  ;;  %1249 = vrot.lane.b32.xlu1 %v676_v19, %s4747_s23  ;;  %v686_v17 = vmul.f32 %v5073_v32, %v5137_v7  ;;  %v5234_v19 = vadd.f32 %v515_v55, %v4957_v48 }
 0x134   : > { %v715_v38 = vmul.f32 %v4955_v47, %v5234_v19  ;;  %v711_v55 = vmul.f32 %v4999_v3, %v5234_v19 }
 0x136   : > { %1416 = vrot.lane.b32.xlu0 %v695_v20, %s4747_s23  ;;  %1247 = vrot.lane.b32.xlu1 %v675_v22, %s4747_s23  ;;  %v5236_v20 = vpop.f32.mrf.mxu1  ;;  %v714_v22 = vmul.f32 %v4962_v51, %v5223_v10 }
 0x13a   : > { %1414 = vrot.lane.b32.xlu0 %v694_v23, %s4747_s23  ;;  %1245 = vrot.lane.b32.xlu1 %v674_v25, %s4747_s23 }
 0x13e   : > { %1412 = vrot.lane.b32.xlu0 %v693_v26, %s4747_s23  ;;  %1243 = vrot.lane.b32.xlu1 %v673_v29, %s4747_s23  ;;  %v685_v26 = vmul.f32 %v5079_v35, %v5128_v61  ;;  %v527_v29 = vpop.f32.mrf.mxu1 }
 0x142   : > { %1410 = vrot.lane.b32.xlu0 %v692_v30, %s4747_s23  ;;  %1241 = vrot.lane.b32.xlu1 %v672_v31, %s4747_s23  ;;  %v713_v30 = vmul.f32 %v4970_v54, %v5234_v19  ;;  %v5256_v31 = vadd.f32 %v527_v29, %v4957_v48  ;;  %v707_v29 = vmul.f32 %v5031_v15, %v5234_v19 }
 0x146   : > { %1408 = vrot.lane.b32.xlu0 %v691_v34, %s4747_s23  ;;  %1239 = vrot.lane.b32.xlu1 %v671_v37, %s4747_s23 }
 0x14a   : > { %1406 = vrot.lane.b32.xlu0 %v690_v40, %s4747_s23  ;;  %1237 = vrot.lane.b32.xlu1 %v670_v41, %s4747_s23  ;;  %v712_v40 = vmul.f32 %v4987_v62, %v5223_v10  ;;  %v5269_v41 = vadd.f32 %v521_v11, %v4957_v48  ;;  %v729_v11 = vmul.f32 %v4970_v54, %v5256_v31 }
 0x14c   : > { %v939_v46 = vpop.permute.xlu1 %938 }
 0x14e   : > { %1404 = vrot.lane.b32.xlu0 %v689_v49, %s4747_s23  ;;  %1235 = vrot.lane.b32.xlu1 %v669_v53, %s4747_s23  ;;  %v731_v53 = vmul.f32 %v4955_v47, %v5256_v31 }
 0x150   : > { %v941_v58 = vpop.permute.xlu0 %940  ;;  %v937_v60 = vpop.permute.xlu1 %936 }
 0x151   : > { %3976 = vmatprep.subr.msk.mxu1 %vm942_vm1, %v941_v58 }
 0x152   : > { %1402 = vrot.lane.b32.xlu0 %v688_v0, %s4747_s23  ;;  %3977 = vmatpush3.xpose.msk.msra.mxu1 %vm942_vm1, %v941_v58  ;;  %v730_v0 = vmul.f32 %v4962_v51, %v5269_v41 }
 0x153   : > { %1233 = vrot.lane.b32.xlu1 %v668_v4, %s4747_s23  ;;  %3978 = vmatprep.subr.msk.mxu1 %vm942_vm1, %v939_v46  ;;  %v710_v4 = vmul.f32 %v5007_v6, %v5223_v10 }
 0x154   : > { %v935_v5 = vpop.permute.xlu1 %934 }
 0x156   : > { %1400 = vrot.lane.b32.xlu0 %v687_v8, %s4747_s23  ;;  %3979 = vmatpush3.xpose.msk.msra.mxu1 %vm942_vm1, %v939_v46 }
 0x157   : > { %1394 = vrot.lane.b32.xlu1 %v684_v13, %s4747_s23  ;;  %3980 = vmatprep.subr.msk.mxu1 %vm942_vm1, %v937_v60  ;;  %v709_v13 = vmul.f32 %v5015_v9, %v5234_v19 }
 0x158   : > { %v1103_v14 = vpop.permute.xlu0 %1102  ;;  %v933_v16 = vpop.permute.xlu1 %932 }
 0x159   : > { %4011 = vmatprep.subr.msk.mxu0 %vm942_vm1, %v1103_v14 }
 0x15a   : > { %1398 = vrot.lane.b32.xlu0 %v686_v17, %s4747_s23  ;;  %3981 = vmatpush3.xpose.msk.msra.mxu1 %vm942_vm1, %v937_v60  ;;  %v728_v17 = vmul.f32 %v4987_v62, %v5269_v41 }
 0x15b   : > { %4012 = vmatpush3.xpose.msk.msra.mxu0 %vm942_vm1, %v1103_v14  ;;  %1583 = vrot.lane.b32.xlu1 %v714_v22, %s4747_s23  ;;  %v708_v22 = vmul.f32 %v5023_v12, %v5223_v10 }
 0x15c   : > { %3982 = vmatprep.subr.msk.mxu1 %vm942_vm1, %v935_v5  ;;  %v1101_v23 = vpop.permute.xlu0 %1100  ;;  %v931_v25 = vpop.permute.xlu1 %930 }
 0x15d   : > { %4013 = vmatprep.subr.msk.mxu0 %vm942_vm1, %v1101_v23 }
 0x15e   : > { %1396 = vrot.lane.b32.xlu0 %v685_v26, %s4747_s23  ;;  %3983 = vmatpush3.xpose.msk.msra.mxu1 %vm942_vm1, %v935_v5  ;;  %v727_v26 = vmul.f32 %v4999_v3, %v5256_v31 }
 0x15f   : > { %4014 = vmatpush3.xpose.msk.msra.mxu0 %vm942_vm1, %v1101_v23  ;;  %1581 = vrot.lane.b32.xlu1 %v713_v30, %s4747_s23 }
 0x160   : > { %3984 = vmatprep.subr.msk.mxu1 %vm942_vm1, %v933_v16  ;;  %v1099_v34 = vpop.permute.xlu0 %1098  ;;  %v929_v37 = vpop.permute.xlu1 %928 }
 0x161   : > { %4015 = vmatprep.subr.msk.mxu0 %vm942_vm1, %v1099_v34 }
 0x162   : > { %1585 = vrot.lane.b32.xlu0 %v715_v38, %s4747_s23  ;;  %3985 = vmatpush3.xpose.msk.msra.mxu1 %vm942_vm1, %v933_v16  ;;  %v706_v38 = vmul.f32 %v5039_v18, %v5223_v10 }
 0x163   : > { %4016 = vmatpush3.xpose.msk.msra.mxu0 %vm942_vm1, %v1099_v34  ;;  %1579 = vrot.lane.b32.xlu1 %v712_v40, %s4747_s23 }
 0x164   : > { %3986 = vmatprep.subr.msk.mxu1 %vm942_vm1, %v931_v25  ;;  %v1097_v46 = vpop.permute.xlu0 %1096  ;;  %v927_v49 = vpop.permute.xlu1 %926 }
 0x165   : > { %4017 = vmatprep.subr.msk.mxu0 %vm942_vm1, %v1097_v46 }
 0x166   : > { %1746 = vrot.lane.b32.xlu0 %v731_v53, %s4747_s23  ;;  %3987 = vmatpush3.xpose.msk.msra.mxu1 %vm942_vm1, %v931_v25  ;;  %v705_v53 = vmul.f32 %v5047_v21, %v5234_v19 }
 0x167   : > { %4018 = vmatpush3.xpose.msk.msra.mxu0 %vm942_vm1, %v1097_v46  ;;  %1577 = vrot.lane.b32.xlu1 %v711_v55, %s4747_s23 }
 0x168   : > { %3988 = vmatprep.subr.msk.mxu1 %vm942_vm1, %v929_v37  ;;  %v1095_v58 = vpop.permute.xlu0 %1094  ;;  %v925_v60 = vpop.permute.xlu1 %924 }
 0x169   : > { %4019 = vmatprep.subr.msk.mxu0 %vm942_vm1, %v1095_v58 }
 0x16a   : > { %1744 = vrot.lane.b32.xlu0 %v730_v0, %s4747_s23  ;;  %3989 = vmatpush3.xpose.msk.msra.mxu1 %vm942_vm1, %v929_v37  ;;  %v726_v37 = vmul.f32 %v5007_v6, %v5269_v41  ;;  %v5344_v0 = vpop.f32.mrf.mxu1 }
 0x16b   : > { %4020 = vmatpush3.xpose.msk.msra.mxu0 %vm942_vm1, %v1095_v58  ;;  %1575 = vrot.lane.b32.xlu1 %v710_v4, %s4747_s23  ;;  %v704_v4 = vmul.f32 %v5055_v24, %v5223_v10 }
 0x16c   : > { %3990 = vmatprep.subr.msk.mxu1 %vm942_vm1, %v927_v49  ;;  %v1093_v5 = vpop.permute.xlu0 %1092  ;;  %v923_v8 = vpop.permute.xlu1 %922 }
 0x16d   : > { %4021 = vmatprep.subr.msk.mxu0 %vm942_vm1, %v1093_v5 }
 0x16e   : > { %1742 = vrot.lane.b32.xlu0 %v729_v11, %s4747_s23  ;;  %3991 = vmatpush3.xpose.msk.msra.mxu1 %vm942_vm1, %v927_v49  ;;  %v725_v49 = vmul.f32 %v5015_v9, %v5256_v31  ;;  %v723_v11 = vmul.f32 %v5031_v15, %v5256_v31 }
 0x16f   : > { %4022 = vmatpush3.xpose.msk.msra.mxu0 %vm942_vm1, %v1093_v5  ;;  %1573 = vrot.lane.b32.xlu1 %v709_v13, %s4747_s23  ;;  %v533_v13 = vpop.f32.mrf.mxu1 }
 0x170   : > { %3992 = vmatprep.subr.msk.mxu1 %vm942_vm1, %v925_v60  ;;  %v1091_v14 = vpop.permute.xlu0 %1090  ;;  %v921_v16 = vpop.permute.xlu1 %920 }
 0x171   : > { %4023 = vmatprep.subr.msk.mxu0 %vm942_vm1, %v1091_v14 }
 0x172   : > { %1740 = vrot.lane.b32.xlu0 %v728_v17, %s4747_s23  ;;  %3993 = vmatpush3.xpose.msk.msra.mxu1 %vm942_vm1, %v925_v60  ;;  %v724_v60 = vmul.f32 %v5023_v12, %v5269_v41 }
 0x173   : > { %4024 = vmatpush3.xpose.msk.msra.mxu0 %vm942_vm1, %v1091_v14  ;;  %1571 = vrot.lane.b32.xlu1 %v708_v22, %s4747_s23  ;;  %v703_v14 = vmul.f32 %v5065_v28, %v5234_v19  ;;  %v722_v22 = vmul.f32 %v5039_v18, %v5269_v41 }
 0x174   : > { %3994 = vmatprep.subr.msk.mxu1 %vm942_vm1, %v923_v8  ;;  %v1089_v23 = vpop.permute.xlu0 %1088  ;;  %v919_v25 = vpop.permute.xlu1 %918 }
 0x175   : > { %4025 = vmatprep.subr.msk.mxu0 %vm942_vm1, %v1089_v23 }
 0x176   : > { %1738 = vrot.lane.b32.xlu0 %v727_v26, %s4747_s23  ;;  %3995 = vmatpush3.xpose.msk.msra.mxu1 %vm942_vm1, %v923_v8 }
 0x177   : > { %4026 = vmatpush3.xpose.msk.msra.mxu0 %vm942_vm1, %v1089_v23  ;;  %1569 = vrot.lane.b32.xlu1 %v707_v29, %s4747_s23  ;;  %v5366_v23 = vpop.f32.mrf.mxu1 }
 0x178   : > { %3996 = vmatprep.subr.msk.mxu1 %vm942_vm1, %v921_v16  ;;  %v1087_v30 = vpop.permute.xlu0 %1086  ;;  %v917_v34 = vpop.permute.xlu1 %916 }
 0x179   : > { %4027 = vmatprep.subr.msk.mxu0 %vm942_vm1, %v1087_v30 }
 0x17a   : > { %1736 = vrot.lane.b32.xlu0 %v726_v37, %s4747_s23  ;;  %3997 = vmatpush3.xpose.msk.msra.mxu1 %vm942_vm1, %v921_v16  ;;  %v701_v37 = vmul.f32 %v5079_v35, %v5234_v19 }
 0x17b   : > { %4028 = vmatpush3.xpose.msk.msra.mxu0 %vm942_vm1, %v1087_v30  ;;  %1567 = vrot.lane.b32.xlu1 %v706_v38, %s4747_s23  ;;  %v721_v30 = vmul.f32 %v5047_v21, %v5256_v31 }
 0x17c   : > { %3998 = vmatprep.subr.msk.mxu1 %vm942_vm1, %v919_v25  ;;  %v1085_v40 = vpop.permute.xlu0 %1084  ;;  %v915_v46 = vpop.permute.xlu1 %914 }
 0x17d   : > { %4029 = vmatprep.subr.msk.mxu0 %vm942_vm1, %v1085_v40 }
 0x17e   : > { %1734 = vrot.lane.b32.xlu0 %v725_v49, %s4747_s23  ;;  %3999 = vmatpush3.xpose.msk.msra.mxu1 %vm942_vm1, %v919_v25  ;;  %v702_v25 = vmul.f32 %v5073_v32, %v5223_v10 }
 0x17f   : > { %4030 = vmatpush3.xpose.msk.msra.mxu0 %vm942_vm1, %v1085_v40  ;;  %1565 = vrot.lane.b32.xlu1 %v705_v53, %s4747_s23  ;;  %v700_v53 = vmul.f32 %v5089_v39, %v5223_v10 }
 0x180   : > { %4000 = vmatprep.subr.msk.mxu1 %vm942_vm1, %v917_v34  ;;  %v1083_v55 = vpop.permute.xlu0 %1082  ;;  %v913_v58 = vpop.permute.xlu1 %912 }
 0x181   : > { %4031 = vmatprep.subr.msk.mxu0 %vm942_vm1, %v1083_v55 }
 0x182   : > { %1732 = vrot.lane.b32.xlu0 %v724_v60, %s4747_s23  ;;  %4001 = vmatpush3.xpose.msk.msra.mxu1 %vm942_vm1, %v917_v34  ;;  %v539_v34 = vpop.f32.mrf.mxu1  ;;  %v5403_v60 = vadd.f32 %v533_v13, %v4957_v48 }
 0x183   : > { %4032 = vmatpush3.xpose.msk.msra.mxu0 %vm942_vm1, %v1083_v55  ;;  %1563 = vrot.lane.b32.xlu1 %v704_v4, %s4747_s23  ;;  %v5416_v13 = vadd.f32 %v539_v34, %v4957_v48 }
 0x184   : > { %4002 = vmatprep.subr.msk.mxu1 %vm942_vm1, %v915_v46  ;;  %v1081_v5 = vpop.permute.xlu0 %1080  ;;  %v911_v8 = vpop.permute.xlu1 %910 }
 0x185   : > { %4033 = vmatprep.subr.msk.mxu0 %vm942_vm1, %v1081_v5  ;;  %v5387_v49 = vpop.f32.mrf.mxu1  ;;  %v747_v34 = vmul.f32 %v4955_v47, %v5416_v13 }
 0x186   : > { %1730 = vrot.lane.b32.xlu0 %v723_v11, %s4747_s23  ;;  %4003 = vmatpush3.xpose.msk.msra.mxu1 %vm942_vm1, %v915_v46  ;;  %v720_v46 = vmul.f32 %v5055_v24, %v5269_v41  ;;  %v718_v11 = vmul.f32 %v5073_v32, %v5269_v41 }
 0x187   : > { %4034 = vmatpush3.xpose.msk.msra.mxu0 %vm942_vm1, %v1081_v5  ;;  %1561 = vrot.lane.b32.xlu1 %v703_v14, %s4747_s23  ;;  %v545_v4 = vpop.f32.mrf.mxu1 }
 0x188   : > { %4004 = vmatprep.subr.msk.mxu1 %vm942_vm1, %v913_v58  ;;  %v1079_v16 = vpop.permute.xlu0 %1078  ;;  %v1073_v17 = vpop.permute.xlu1 %1072 }
 0x189   : > { %4035 = vmatprep.subr.msk.mxu0 %vm942_vm1, %v1079_v16  ;;  %v5418_v14 = vpop.f32.mrf.mxu1 }
 0x18a   : > { %1728 = vrot.lane.b32.xlu0 %v722_v22, %s4747_s23  ;;  %4005 = vmatpush3.xpose.msk.msra.mxu1 %vm942_vm1, %v913_v58 }
 0x18b   : > { %4036 = vmatpush3.xpose.msk.msra.mxu0 %vm942_vm1, %v1079_v16  ;;  %1559 = vrot.lane.b32.xlu1 %v702_v25, %s4747_s23  ;;  %v746_v16 = vmul.f32 %v4962_v51, %v5403_v60  ;;  %v717_v25 = vmul.f32 %v5079_v35, %v5256_v31 }
 0x18c   : > { %4006 = vmatprep.subr.msk.mxu1 %vm942_vm1, %v911_v8  ;;  %v1077_v26 = vpop.permute.xlu0 %1076  ;;  %v1262_v29 = vpop.permute.xlu1 %1261 }
 0x18d   : > { %4037 = vmatprep.subr.msk.mxu0 %vm942_vm1, %v1077_v26 }
 0x18e   : > { %1726 = vrot.lane.b32.xlu0 %v721_v30, %s4747_s23  ;;  %4007 = vmatpush3.xpose.msk.msra.mxu1 %vm942_vm1, %v911_v8 }
 0x18f   : > { %4038 = vmatpush3.xpose.msk.msra.mxu0 %vm942_vm1, %v1077_v26  ;;  %1557 = vrot.lane.b32.xlu1 %v701_v37, %s4747_s23  ;;  %v551_v26 = vpop.f32.mrf.mxu1  ;;  %v744_v37 = vmul.f32 %v4987_v62, %v5403_v60 }
 0x190   : > { %v1075_v38 = vpop.permute.xlu0 %1074  ;;  %v1260_v40 = vpop.permute.xlu1 %1259 }
 0x191   : > { %4009 = vmatmul.mubr.msk.f32.vlgmr.msra.gmra.mxu1 %vm942_vm1, %v4973_v56  ;;  %4039 = vmatprep.subr.msk.mxu0 %vm942_vm1, %v1075_v38  ;;  %v719_v56 = vmul.f32 %v5065_v28, %v5256_v31 }
 0x192   : > { %1724 = vrot.lane.b32.xlu0 %v720_v46, %s4747_s23  ;;  %4078 = vmatprep.mubr.msk.f32.mxu1 %vm942_vm1, %v5102_v44  ;;  %v716_v44 = vmul.f32 %v5089_v39, %v5269_v41 }
 0x193   : > { %4040 = vmatpush3.xpose.msk.msra.mxu0 %vm942_vm1, %v1075_v38  ;;  %1555 = vrot.lane.b32.xlu1 %v700_v53, %s4747_s23  ;;  %v5454_v38 = vadd.f32 %v545_v4, %v4957_v48 }
 0x194   : > { %4041 = vmatprep.subr.msk.mxu0 %vm942_vm1, %v1073_v17  ;;  %v1264_v55 = vpop.permute.xlu0 %1263  ;;  %v1258_v58 = vpop.permute.xlu1 %1257 }
 0x195   : > { %4046 = vmatprep.subr.msk.mxu1 %vm942_vm1, %v1264_v55 }
 0x196   : > { %1722 = vrot.lane.b32.xlu0 %v719_v56, %s4747_s23  ;;  %4047 = vmatpush3.xpose.msk.msra.mxu1 %vm942_vm1, %v1264_v55  ;;  %v743_v55 = vmul.f32 %v4999_v3, %v5416_v13  ;;  %v742_v56 = vmul.f32 %v5007_v6, %v5403_v60 }
 0x197   : > { %1716 = vrot.lane.b32.xlu1 %v716_v44, %s4747_s23  ;;  %4042 = vmatpush3.xpose.msk.msra.mxu0 %vm942_vm1, %v1073_v17 }
 0x198   : > { %4048 = vmatprep.subr.msk.mxu1 %vm942_vm1, %v1262_v29  ;;  %v1425_v5 = vpop.permute.xlu0 %1424  ;;  %v1256_v8 = vpop.permute.xlu1 %1255 }
 0x199   : > { %4081 = vmatprep.subr.msk.mxu0 %vm942_vm1, %v1425_v5 }
 0x19a   : > { %4044 = vmatmul.mubr.msk.f32.vlgmr.msra.gmra.mxu0 %vm942_vm1, %v4996_v2  ;;  %1720 = vrot.lane.b32.xlu0 %v718_v11, %s4747_s23  ;;  %v745_v2 = vmul.f32 %v4970_v54, %v5416_v13 }
 0x19b   : > { %1905 = vrot.lane.b32.xlu1 %v746_v16, %s4747_s23  ;;  %4049 = vmatpush3.xpose.msk.msra.mxu1 %vm942_vm1, %v1262_v29  ;;  %v740_v16 = vmul.f32 %v5023_v12, %v5403_v60 }
 0x19c   : > { %4082 = vmatpush3.xpose.msk.msra.mxu0 %vm942_vm1, %v1425_v5  ;;  %4113 = vmatprep.mubr.msk.f32.mxu0 %vm942_vm1, %v5137_v7  ;;  %v1423_v17 = vpop.permute.xlu0 %1422  ;;  %v1254_v22 = vpop.permute.xlu1 %1253  ;;  %v5441_v7 = vadd.f32 %v551_v26, %v4957_v48  ;;  %v741_v5 = vmul.f32 %v5015_v9, %v5416_v13 }
 0x19d   : > { %4050 = vmatprep.subr.msk.mxu1 %vm942_vm1, %v1260_v40  ;;  %4083 = vmatprep.subr.msk.mxu0 %vm942_vm1, %v1423_v17 }
 0x19e   : > { %1718 = vrot.lane.b32.xlu0 %v717_v25, %s4747_s23  ;;  %v763_v53 = vmul.f32 %v4955_v47, %v5441_v7  ;;  %v762_v47 = vmul.f32 %v4962_v51, %v5454_v38  ;;  %v761_v51 = vmul.f32 %v4970_v54, %v5441_v7  ;;  %v760_v54 = vmul.f32 %v4987_v62, %v5454_v38 }
 0x19f   : > { %1903 = vrot.lane.b32.xlu1 %v745_v2, %s4747_s23  ;;  %4051 = vmatpush3.xpose.msk.msra.mxu1 %vm942_vm1, %v1260_v40  ;;  %v759_v62 = vmul.f32 %v4999_v3, %v5441_v7  ;;  %v739_v25 = vmul.f32 %v5031_v15, %v5416_v13  ;;  %v758_v3 = vmul.f32 %v5007_v6, %v5454_v38 }
 0x1a0   : > { %4084 = vmatpush3.xpose.msk.msra.mxu0 %vm942_vm1, %v1423_v17  ;;  %4052 = vmatprep.subr.msk.mxu1 %vm942_vm1, %v1258_v58  ;;  %v1421_v29 = vpop.permute.xlu0 %1420  ;;  %v1252_v30 = vpop.permute.xlu1 %1251  ;;  %v757_v6 = vmul.f32 %v5015_v9, %v5441_v7  ;;  %v756_v9 = vmul.f32 %v5023_v12, %v5454_v38 }
 0x1a1   : > { %4085 = vmatprep.subr.msk.mxu0 %vm942_vm1, %v1421_v29 }
 0x1a2   : > { %1907 = vrot.lane.b32.xlu0 %v747_v34, %s4747_s23 }
 0x1a3   : > { %1901 = vrot.lane.b32.xlu1 %v744_v37, %s4747_s23  ;;  %4053 = vmatpush3.xpose.msk.msra.mxu1 %vm942_vm1, %v1258_v58  ;;  %v737_v37 = vmul.f32 %v5047_v21, %v5416_v13 }
 0x1a4   : > { %4086 = vmatpush3.xpose.msk.msra.mxu0 %vm942_vm1, %v1421_v29  ;;  %4054 = vmatprep.subr.msk.mxu1 %vm942_vm1, %v1256_v8  ;;  %v1419_v40 = vpop.permute.xlu0 %1418  ;;  %v1250_v46 = vpop.permute.xlu1 %1249  ;;  %v738_v29 = vmul.f32 %v5039_v18, %v5403_v60 }
 0x1a5   : > { %4087 = vmatprep.subr.msk.mxu0 %vm942_vm1, %v1419_v40 }
 0x1a6   : > { %2068 = vrot.lane.b32.xlu0 %v763_v53, %s4747_s23  ;;  %v736_v53 = vmul.f32 %v5055_v24, %v5403_v60 }
 0x1a7   : > { %1899 = vrot.lane.b32.xlu1 %v743_v55, %s4747_s23  ;;  %4055 = vmatpush3.xpose.msk.msra.mxu1 %vm942_vm1, %v1256_v8 }
 0x1a8   : > { %4088 = vmatpush3.xpose.msk.msra.mxu0 %vm942_vm1, %v1419_v40  ;;  %4056 = vmatprep.subr.msk.mxu1 %vm942_vm1, %v1254_v22  ;;  %v1417_v48 = vpop.permute.xlu0 %1416  ;;  %v1248_v58 = vpop.permute.xlu1 %1247 }
 0x1a9   : > { %4089 = vmatprep.subr.msk.mxu0 %vm942_vm1, %v1417_v48 }
 0x1aa   : > { %2066 = vrot.lane.b32.xlu0 %v762_v47, %s4747_s23 }
 0x1ab   : > { %1897 = vrot.lane.b32.xlu1 %v742_v56, %s4747_s23  ;;  %4057 = vmatpush3.xpose.msk.msra.mxu1 %vm942_vm1, %v1254_v22 }
 0x1ac   : > { %4090 = vmatpush3.xpose.msk.msra.mxu0 %vm942_vm1, %v1417_v48  ;;  %4058 = vmatprep.subr.msk.mxu1 %vm942_vm1, %v1252_v30  ;;  %v1415_v4 = vpop.permute.xlu0 %1414  ;;  %v1246_v44 = vpop.permute.xlu1 %1245  ;;  %v755_v48 = vmul.f32 %v5031_v15, %v5441_v7  ;;  %v754_v15 = vmul.f32 %v5039_v18, %v5454_v38  ;;  %v753_v18 = vmul.f32 %v5047_v21, %v5441_v7 }
 0x1ad   : > { %4091 = vmatprep.subr.msk.mxu0 %vm942_vm1, %v1415_v4  ;;  %v752_v21 = vmul.f32 %v5055_v24, %v5454_v38 }
 0x1ae   : > { %2064 = vrot.lane.b32.xlu0 %v761_v51, %s4747_s23 }
 0x1af   : > { %1895 = vrot.lane.b32.xlu1 %v741_v5, %s4747_s23  ;;  %4059 = vmatpush3.xpose.msk.msra.mxu1 %vm942_vm1, %v1252_v30  ;;  %v733_v5 = vmul.f32 %v5079_v35, %v5416_v13 }
 0x1b0   : > { %4092 = vmatpush3.xpose.msk.msra.mxu0 %vm942_vm1, %v1415_v4  ;;  %4060 = vmatprep.subr.msk.mxu1 %vm942_vm1, %v1250_v46  ;;  %v1413_v8 = vpop.permute.xlu0 %1412  ;;  %v1244_v11 = vpop.permute.xlu1 %1243  ;;  %v734_v4 = vmul.f32 %v5073_v32, %v5403_v60 }
 0x1b1   : > { %4093 = vmatprep.subr.msk.mxu0 %vm942_vm1, %v1413_v8 }
 0x1b2   : > { %2062 = vrot.lane.b32.xlu0 %v760_v54, %s4747_s23  ;;  %v732_v54 = vmul.f32 %v5089_v39, %v5403_v60 }
 0x1b3   : > { %1893 = vrot.lane.b32.xlu1 %v740_v16, %s4747_s23  ;;  %4061 = vmatpush3.xpose.msk.msra.mxu1 %vm942_vm1, %v1250_v46 }
 0x1b4   : > { %4094 = vmatpush3.xpose.msk.msra.mxu0 %vm942_vm1, %v1413_v8  ;;  %4062 = vmatprep.subr.msk.mxu1 %vm942_vm1, %v1248_v58  ;;  %v1411_v17 = vpop.permute.xlu0 %1410  ;;  %v1242_v22 = vpop.permute.xlu1 %1241 }
 0x1b5   : > { %4095 = vmatprep.subr.msk.mxu0 %vm942_vm1, %v1411_v17 }
 0x1b6   : > { %2060 = vrot.lane.b32.xlu0 %v759_v62, %s4747_s23  ;;  %v750_v62 = vmul.f32 %v5073_v32, %v5454_v38  ;;  %v749_v32 = vmul.f32 %v5079_v35, %v5441_v7 }
 0x1b7   : > { %1891 = vrot.lane.b32.xlu1 %v739_v25, %s4747_s23  ;;  %4063 = vmatpush3.xpose.msk.msra.mxu1 %vm942_vm1, %v1248_v58  ;;  %v735_v58 = vmul.f32 %v5065_v28, %v5416_v13 }
 0x1b8   : > { %4096 = vmatpush3.xpose.msk.msra.mxu0 %vm942_vm1, %v1411_v17  ;;  %4064 = vmatprep.subr.msk.mxu1 %vm942_vm1, %v1246_v44  ;;  %v1409_v26 = vpop.permute.xlu0 %1408  ;;  %v1240_v2 = vpop.permute.xlu1 %1239  ;;  %v751_v17 = vmul.f32 %v5065_v28, %v5441_v7 }
 0x1b9   : > { %4097 = vmatprep.subr.msk.mxu0 %vm942_vm1, %v1409_v26 }
 0x1ba   : > { %2058 = vrot.lane.b32.xlu0 %v758_v3, %s4747_s23 }
 0x1bb   : > { %1889 = vrot.lane.b32.xlu1 %v738_v29, %s4747_s23  ;;  %4065 = vmatpush3.xpose.msk.msra.mxu1 %vm942_vm1, %v1246_v44 }
 0x1bc   : > { %4098 = vmatpush3.xpose.msk.msra.mxu0 %vm942_vm1, %v1409_v26  ;;  %4066 = vmatprep.subr.msk.mxu1 %vm942_vm1, %v1244_v11  ;;  %v1407_v30 = vpop.permute.xlu0 %1406  ;;  %v1238_v34 = vpop.permute.xlu1 %1237 }
 0x1bd   : > { %4099 = vmatprep.subr.msk.mxu0 %vm942_vm1, %v1407_v30 }
 0x1be   : > { %2056 = vrot.lane.b32.xlu0 %v757_v6, %s4747_s23 }
 0x1bf   : > { %1887 = vrot.lane.b32.xlu1 %v737_v37, %s4747_s23  ;;  %4067 = vmatpush3.xpose.msk.msra.mxu1 %vm942_vm1, %v1244_v11 }
 0x1c0   : > { %4100 = vmatpush3.xpose.msk.msra.mxu0 %vm942_vm1, %v1407_v30  ;;  %4068 = vmatprep.subr.msk.mxu1 %vm942_vm1, %v1242_v22  ;;  %v1405_v40 = vpop.permute.xlu0 %1404  ;;  %v1236_v46 = vpop.permute.xlu1 %1235 }
 0x1c1   : > { %4101 = vmatprep.subr.msk.mxu0 %vm942_vm1, %v1405_v40 }
 0x1c2   : > { %2054 = vrot.lane.b32.xlu0 %v756_v9, %s4747_s23 }
 0x1c3   : > { %1885 = vrot.lane.b32.xlu1 %v736_v53, %s4747_s23  ;;  %4069 = vmatpush3.xpose.msk.msra.mxu1 %vm942_vm1, %v1242_v22  ;;  %v748_v22 = vmul.f32 %v5089_v39, %v5454_v38 }
 0x1c4   : > { %4102 = vmatpush3.xpose.msk.msra.mxu0 %vm942_vm1, %v1405_v40  ;;  %4070 = vmatprep.subr.msk.mxu1 %vm942_vm1, %v1240_v2  ;;  %v1403_v55 = vpop.permute.xlu0 %1402 }
 0x1c5   : > { %v1234_v12 = vpop.permute.xlu1 %1233  ;;  %4103 = vmatprep.subr.msk.mxu0 %vm942_vm1, %v1403_v55 }
 0x1c6   : > { %2052 = vrot.lane.b32.xlu0 %v755_v48, %s4747_s23 }
 0x1c7   : > { %1883 = vrot.lane.b32.xlu1 %v735_v58, %s4747_s23  ;;  %4071 = vmatpush3.xpose.msk.msra.mxu1 %vm942_vm1, %v1240_v2 }
 0x1c8   : > { %4104 = vmatpush3.xpose.msk.msra.mxu0 %vm942_vm1, %v1403_v55  ;;  %4072 = vmatprep.subr.msk.mxu1 %vm942_vm1, %v1238_v34  ;;  %v1401_v47 = vpop.permute.xlu0 %1400 }
 0x1c9   : > { %v1395_v56 = vpop.permute.xlu1 %1394  ;;  %4105 = vmatprep.subr.msk.mxu0 %vm942_vm1, %v1401_v47 }
 0x1ca   : > { %2050 = vrot.lane.b32.xlu0 %v754_v15, %s4747_s23 }
 0x1cb   : > { %1881 = vrot.lane.b32.xlu1 %v734_v4, %s4747_s23  ;;  %4073 = vmatpush3.xpose.msk.msra.mxu1 %vm942_vm1, %v1238_v34 }
 0x1cc   : > { %4106 = vmatpush3.xpose.msk.msra.mxu0 %vm942_vm1, %v1401_v47  ;;  %4074 = vmatprep.subr.msk.mxu1 %vm942_vm1, %v1236_v46  ;;  %v1399_v44 = vpop.permute.xlu0 %1398 }
 0x1cd   : > { %v1584_v51 = vpop.permute.xlu1 %1583  ;;  %4107 = vmatprep.subr.msk.mxu0 %vm942_vm1, %v1399_v44 }
 0x1ce   : > { %2048 = vrot.lane.b32.xlu0 %v753_v18, %s4747_s23 }
 0x1cf   : > { %1879 = vrot.lane.b32.xlu1 %v733_v5, %s4747_s23  ;;  %4075 = vmatpush3.xpose.msk.msra.mxu1 %vm942_vm1, %v1236_v46 }
 0x1d0   : > { %4108 = vmatpush3.xpose.msk.msra.mxu0 %vm942_vm1, %v1399_v44  ;;  %4076 = vmatprep.subr.msk.mxu1 %vm942_vm1, %v1234_v12  ;;  %v1397_v8 = vpop.permute.xlu0 %1396 }
 0x1d1   : > { %v1582_v11 = vpop.permute.xlu1 %1581  ;;  %4109 = vmatprep.subr.msk.mxu0 %vm942_vm1, %v1397_v8 }
 0x1d2   : > { %2046 = vrot.lane.b32.xlu0 %v752_v21, %s4747_s23 }
 0x1d3   : > { %1877 = vrot.lane.b32.xlu1 %v732_v54, %s4747_s23  ;;  %4077 = vmatpush3.xpose.msk.msra.mxu1 %vm942_vm1, %v1234_v12 }
 0x1d4   : > { %4110 = vmatpush3.xpose.msk.msra.mxu0 %vm942_vm1, %v1397_v8  ;;  %v1586_v16 = vpop.permute.xlu0 %1585 }
 0x1d5   : > { %4111 = vmatprep.subr.msk.mxu0 %vm942_vm1, %v1395_v56  ;;  %v1580_v24 = vpop.permute.xlu1 %1579  ;;  %4116 = vmatprep.subr.msk.mxu1 %vm942_vm1, %v1586_v16 }
 0x1d6   : > { %4079 = vmatmul.mubr.msk.f32.vlgmr.msra.gmra.mxu1 %vm942_vm1, %v5111_v50  ;;  %2044 = vrot.lane.b32.xlu0 %v751_v17, %s4747_s23 }
 0x1d7   : > { %2038 = vrot.lane.b32.xlu1 %v748_v22, %s4747_s23  ;;  %4117 = vmatpush3.xpose.msk.msra.mxu1 %vm942_vm1, %v1586_v16 }
 0x1d8   : > { %4112 = vmatpush3.xpose.msk.msra.mxu0 %vm942_vm1, %v1395_v56  ;;  %4148 = vmatprep.mubr.msk.f32.mxu1 %vm942_vm1, %v5223_v10  ;;  %v1747_v28 = vpop.permute.xlu0 %1746 }
 0x1d9   : > { %4118 = vmatprep.subr.msk.mxu1 %vm942_vm1, %v1584_v51  ;;  %v1578_v39 = vpop.permute.xlu1 %1577  ;;  %4151 = vmatprep.subr.msk.mxu0 %vm942_vm1, %v1747_v28 }
 0x1da   : > { %2042 = vrot.lane.b32.xlu0 %v750_v62, %s4747_s23 }
 0x1db   : > { %4114 = vmatmul.mubr.msk.f32.vlgmr.msra.gmra.mxu0 %vm942_vm1, %v5128_v61  ;;  %4119 = vmatpush3.xpose.msk.msra.mxu1 %vm942_vm1, %v1584_v51 }
 0x1dc   : > { %4152 = vmatpush3.xpose.msk.msra.mxu0 %vm942_vm1, %v1747_v28  ;;  %4183 = vmatprep.mubr.msk.f32.mxu0 %vm942_vm1, %v5269_v41  ;;  %v1745_v50 = vpop.permute.xlu0 %1744 }
 0x1dd   : > { %4120 = vmatprep.subr.msk.mxu1 %vm942_vm1, %v1582_v11  ;;  %v1576_v10 = vpop.permute.xlu1 %1575  ;;  %4153 = vmatprep.subr.msk.mxu0 %vm942_vm1, %v1745_v50 }
 0x1de   : > { %2040 = vrot.lane.b32.xlu0 %v749_v32, %s4747_s23 }
 0x1df   : > { %4121 = vmatpush3.xpose.msk.msra.mxu1 %vm942_vm1, %v1582_v11 }
 0x1e0   : > { %4154 = vmatpush3.xpose.msk.msra.mxu0 %vm942_vm1, %v1745_v50  ;;  %4122 = vmatprep.subr.msk.mxu1 %vm942_vm1, %v1580_v24  ;;  %v1743_v61 = vpop.permute.xlu0 %1742 }
 0x1e1   : > { %v1574_v25 = vpop.permute.xlu1 %1573  ;;  %4155 = vmatprep.subr.msk.mxu0 %vm942_vm1, %v1743_v61 }
 0x1e3   : > { %4123 = vmatpush3.xpose.msk.msra.mxu1 %vm942_vm1, %v1580_v24 }
 0x1e4   : > { %4156 = vmatpush3.xpose.msk.msra.mxu0 %vm942_vm1, %v1743_v61  ;;  %4124 = vmatprep.subr.msk.mxu1 %vm942_vm1, %v1578_v39  ;;  %v1741_v35 = vpop.permute.xlu0 %1740 }
 0x1e5   : > { %v1572_v41 = vpop.permute.xlu1 %1571  ;;  %4157 = vmatprep.subr.msk.mxu0 %vm942_vm1, %v1741_v35 }
 0x1e7   : > { %4125 = vmatpush3.xpose.msk.msra.mxu1 %vm942_vm1, %v1578_v39 }
 0x1e8   : > { %4158 = vmatpush3.xpose.msk.msra.mxu0 %vm942_vm1, %v1741_v35  ;;  %4126 = vmatprep.subr.msk.mxu1 %vm942_vm1, %v1576_v10  ;;  %v1739_v26 = vpop.permute.xlu0 %1738 }
 0x1e9   : > { %v1570_v2 = vpop.permute.xlu1 %1569  ;;  %4159 = vmatprep.subr.msk.mxu0 %vm942_vm1, %v1739_v26 }
 0x1eb   : > { %4127 = vmatpush3.xpose.msk.msra.mxu1 %vm942_vm1, %v1576_v10 }
 0x1ec   : > { %4160 = vmatpush3.xpose.msk.msra.mxu0 %vm942_vm1, %v1739_v26  ;;  %4128 = vmatprep.subr.msk.mxu1 %vm942_vm1, %v1574_v25  ;;  %v1737_v3 = vpop.permute.xlu0 %1736 }
 0x1ed   : > { %v1568_v29 = vpop.permute.xlu1 %1567  ;;  %4161 = vmatprep.subr.msk.mxu0 %vm942_vm1, %v1737_v3 }
 0x1ef   : > { %4129 = vmatpush3.xpose.msk.msra.mxu1 %vm942_vm1, %v1574_v25 }
 0x1f0   : > { %4162 = vmatpush3.xpose.msk.msra.mxu0 %vm942_vm1, %v1737_v3  ;;  %4130 = vmatprep.subr.msk.mxu1 %vm942_vm1, %v1572_v41  ;;  %v1735_v30 = vpop.permute.xlu0 %1734 }
 0x1f1   : > { %v1566_v34 = vpop.permute.xlu1 %1565  ;;  %4163 = vmatprep.subr.msk.mxu0 %vm942_vm1, %v1735_v30 }
 0x1f3   : > { %4131 = vmatpush3.xpose.msk.msra.mxu1 %vm942_vm1, %v1572_v41 }
 0x1f4   : > { %4164 = vmatpush3.xpose.msk.msra.mxu0 %vm942_vm1, %v1735_v30  ;;  %4132 = vmatprep.subr.msk.mxu1 %vm942_vm1, %v1570_v2  ;;  %v1733_v6 = vpop.permute.xlu0 %1732  ;;  %v5727_v30 = vpop.f32.mrf.mxu1 }
 0x1f5   : > { %v1564_v37 = vpop.permute.xlu1 %1563  ;;  %4165 = vmatprep.subr.msk.mxu0 %vm942_vm1, %v1733_v6 }
 0x1f7   : > { %4133 = vmatpush3.xpose.msk.msra.mxu1 %vm942_vm1, %v1570_v2 }
 0x1f8   : > { %4166 = vmatpush3.xpose.msk.msra.mxu0 %vm942_vm1, %v1733_v6  ;;  %4134 = vmatprep.subr.msk.mxu1 %vm942_vm1, %v1568_v29  ;;  %v1731_v40 = vpop.permute.xlu0 %1730 }
 0x1f9   : > { %v1562_v46 = vpop.permute.xlu1 %1561  ;;  %4167 = vmatprep.subr.msk.mxu0 %vm942_vm1, %v1731_v40 }
 0x1fb   : > { %4135 = vmatpush3.xpose.msk.msra.mxu1 %vm942_vm1, %v1568_v29 }
 0x1fc   : > { %4168 = vmatpush3.xpose.msk.msra.mxu0 %vm942_vm1, %v1731_v40  ;;  %4136 = vmatprep.subr.msk.mxu1 %vm942_vm1, %v1566_v34  ;;  %v1729_v9 = vpop.permute.xlu0 %1728  ;;  %v5741_v40 = vld [vmem:[%s6485_s4] sm:$0xff] }
 0x1fd   : > { %v1560_v53 = vpop.permute.xlu1 %1559  ;;  %4169 = vmatprep.subr.msk.mxu0 %vm942_vm1, %v1729_v9 }
 0x1ff   : > { %4137 = vmatpush3.xpose.msk.msra.mxu1 %vm942_vm1, %v1566_v34  ;;  %v5733_v34 = vld [vmem:[%s6485_s4 + $0x8] sm:$0xff] }
 0x200   : > { %4170 = vmatpush3.xpose.msk.msra.mxu0 %vm942_vm1, %v1729_v9  ;;  %4138 = vmatprep.subr.msk.mxu1 %vm942_vm1, %v1564_v37  ;;  %v1727_v55 = vpop.permute.xlu0 %1726  ;;  %v2278_v9 = vld [vmem:[%s6486_s5 + $0x78] sm:$0xff] }
 0x201   : > { %v1558_v48 = vpop.permute.xlu1 %1557  ;;  %4171 = vmatprep.subr.msk.mxu0 %vm942_vm1, %v1727_v55 }
 0x203   : > { %4139 = vmatpush3.xpose.msk.msra.mxu1 %vm942_vm1, %v1564_v37 }
 0x204   : > { %4172 = vmatpush3.xpose.msk.msra.mxu0 %vm942_vm1, %v1727_v55  ;;  %4140 = vmatprep.subr.msk.mxu1 %vm942_vm1, %v1562_v46  ;;  %v1725_v12 = vpop.permute.xlu0 %1724 }
 0x205   : > { %v1556_v58 = vpop.permute.xlu1 %1555  ;;  %4173 = vmatprep.subr.msk.mxu0 %vm942_vm1, %v1725_v12 }
 0x207   : > { %4141 = vmatpush3.xpose.msk.msra.mxu1 %vm942_vm1, %v1562_v46 }
 0x208   : > { %4174 = vmatpush3.xpose.msk.msra.mxu0 %vm942_vm1, %v1725_v12  ;;  %4142 = vmatprep.subr.msk.mxu1 %vm942_vm1, %v1560_v53  ;;  %v1723_v47 = vpop.permute.xlu0 %1722 }
 0x209   : > { %v1717_v15 = vpop.permute.xlu1 %1716  ;;  %4175 = vmatprep.subr.msk.mxu0 %vm942_vm1, %v1723_v47 }
 0x20b   : > { %4143 = vmatpush3.xpose.msk.msra.mxu1 %vm942_vm1, %v1560_v53  ;;  %v5751_v53 = vadd.f32 %v4976_v57, %v4953_v45  ;;  %v5768_v57 = vadd.f32 %v4964_v52, %v4953_v45  ;;  %v2275_v52 = vld [vmem:[%s6486_s5 + $0x60] sm:$0xff] }
 0x20c   : > { %4176 = vmatpush3.xpose.msk.msra.mxu0 %vm942_vm1, %v1723_v47  ;;  %4144 = vmatprep.subr.msk.mxu1 %vm942_vm1, %v1558_v48  ;;  %v1721_v56 = vpop.permute.xlu0 %1720  ;;  %v5773_v47 = vld [vmem:[%s6484_s3 + $0x78] sm:$0xff] }
 0x20d   : > { %v1906_v4 = vpop.permute.xlu1 %1905  ;;  %4177 = vmatprep.subr.msk.mxu0 %vm942_vm1, %v1721_v56 }
 0x20f   : > { %4145 = vmatpush3.xpose.msk.msra.mxu1 %vm942_vm1, %v1558_v48 }
 0x210   : > { %4178 = vmatpush3.xpose.msk.msra.mxu0 %vm942_vm1, %v1721_v56  ;;  %4146 = vmatprep.subr.msk.mxu1 %vm942_vm1, %v1556_v58  ;;  %v1719_v44 = vpop.permute.xlu0 %1718  ;;  %v2276_v56 = vld [vmem:[%s6486_s5 + $0x68] sm:$0xff] }
 0x211   : > { %v1904_v18 = vpop.permute.xlu1 %1903  ;;  %4179 = vmatprep.subr.msk.mxu0 %vm942_vm1, %v1719_v44 }
 0x213   : > { %4147 = vmatpush3.xpose.msk.msra.mxu1 %vm942_vm1, %v1556_v58  ;;  %v2277_v58 = vld [vmem:[%s6486_s5 + $0x70] sm:$0xff] }
 0x214   : > { %4180 = vmatpush3.xpose.msk.msra.mxu0 %vm942_vm1, %v1719_v44  ;;  %v1908_v51 = vpop.permute.xlu0 %1907 }
 0x215   : > { %4181 = vmatprep.subr.msk.mxu0 %vm942_vm1, %v1717_v15  ;;  %v1902_v5 = vpop.permute.xlu1 %1901  ;;  %4186 = vmatprep.subr.msk.mxu1 %vm942_vm1, %v1908_v51 }
 0x216   : > { %4149 = vmatmul.mubr.msk.f32.vlgmr.msra.gmra.mxu1 %vm942_vm1, %v5234_v19 }
 0x217   : > { %4187 = vmatpush3.xpose.msk.msra.mxu1 %vm942_vm1, %v1908_v51  ;;  %4218 = vmatprep.mubr.msk.f32.mxu1 %vm942_vm1, %v5403_v60 }
 0x218   : > { %4182 = vmatpush3.xpose.msk.msra.mxu0 %vm942_vm1, %v1717_v15  ;;  %4188 = vmatprep.subr.msk.mxu1 %vm942_vm1, %v1906_v4  ;;  %v2069_v8 = vpop.permute.xlu0 %2068  ;;  %v779_v15 = vmul.f32 %v5773_v47, %v5751_v53 }
 0x219   : > { %v1900_v21 = vpop.permute.xlu1 %1899  ;;  %4221 = vmatprep.subr.msk.mxu0 %vm942_vm1, %v2069_v8 }
 0x21b   : > { %4184 = vmatmul.mubr.msk.f32.vlgmr.msra.gmra.mxu0 %vm942_vm1, %v5256_v31  ;;  %4189 = vmatpush3.xpose.msk.msra.mxu1 %vm942_vm1, %v1906_v4  ;;  %v5789_v4 = vld [vmem:[%s6484_s3 + $0x70] sm:$0xff] }
 0x21c   : > { %4222 = vmatpush3.xpose.msk.msra.mxu0 %vm942_vm1, %v2069_v8  ;;  %4253 = vmatprep.mubr.msk.f32.mxu0 %vm942_vm1, %v5454_v38  ;;  %v2067_v19 = vpop.permute.xlu0 %2066  ;;  %v778_v44 = vmul.f32 %v5789_v4, %v5768_v57 }
 0x21d   : > { %4190 = vmatprep.subr.msk.mxu1 %vm942_vm1, %v1904_v18  ;;  %v1898_v60 = vpop.permute.xlu1 %1897  ;;  %4223 = vmatprep.subr.msk.mxu0 %vm942_vm1, %v2067_v19 }
 0x21f   : > { %4191 = vmatpush3.xpose.msk.msra.mxu1 %vm942_vm1, %v1904_v18  ;;  %v2274_v18 = vld [vmem:[%s6486_s5 + $0x58] sm:$0xff] }
 0x220   : > { %4224 = vmatpush3.xpose.msk.msra.mxu0 %vm942_vm1, %v2067_v19  ;;  %4192 = vmatprep.subr.msk.mxu1 %vm942_vm1, %v1902_v5  ;;  %v2065_v31 = vpop.permute.xlu0 %2064  ;;  %v5813_v19 = vld [vmem:[%s6484_s3 + $0x60] sm:$0xff] }
 0x221   : > { %v1896_v11 = vpop.permute.xlu1 %1895  ;;  %4225 = vmatprep.subr.msk.mxu0 %vm942_vm1, %v2065_v31 }
 0x223   : > { %4193 = vmatpush3.xpose.msk.msra.mxu1 %vm942_vm1, %v1902_v5 }
 0x224   : > { %4226 = vmatpush3.xpose.msk.msra.mxu0 %vm942_vm1, %v2065_v31  ;;  %4194 = vmatprep.subr.msk.mxu1 %vm942_vm1, %v1900_v21  ;;  %v2063_v38 = vpop.permute.xlu0 %2062  ;;  %v2272_v31 = vld [vmem:[%s6486_s5 + $0x48] sm:$0xff] }
 0x225   : > { %v1894_v54 = vpop.permute.xlu1 %1893  ;;  %4227 = vmatprep.subr.msk.mxu0 %vm942_vm1, %v2063_v38 }
 0x227   : > { %4195 = vmatpush3.xpose.msk.msra.mxu1 %vm942_vm1, %v1900_v21  ;;  %v2273_v21 = vld [vmem:[%s6486_s5 + $0x50] sm:$0xff] }
 0x228   : > { %4228 = vmatpush3.xpose.msk.msra.mxu0 %vm942_vm1, %v2063_v38  ;;  %4196 = vmatprep.subr.msk.mxu1 %vm942_vm1, %v1898_v60  ;;  %v2061_v16 = vpop.permute.xlu0 %2060 }
 0x229   : > { %v1892_v17 = vpop.permute.xlu1 %1891  ;;  %4229 = vmatprep.subr.msk.mxu0 %vm942_vm1, %v2061_v16 }
 0x22b   : > { %4197 = vmatpush3.xpose.msk.msra.mxu1 %vm942_vm1, %v1898_v60  ;;  %v776_v60 = vmul.f32 %v5813_v19, %v5768_v57 }
 0x22c   : > { %4230 = vmatpush3.xpose.msk.msra.mxu0 %vm942_vm1, %v2061_v16  ;;  %4198 = vmatprep.subr.msk.mxu1 %vm942_vm1, %v1896_v11  ;;  %v2059_v24 = vpop.permute.xlu0 %2058  ;;  %v2271_v16 = vld [vmem:[%s6486_s5 + $0x40] sm:$0xff] }
 0x22d   : > { %v1890_v22 = vpop.permute.xlu1 %1889  ;;  %4231 = vmatprep.subr.msk.mxu0 %vm942_vm1, %v2059_v24 }
 0x22f   : > { %4199 = vmatpush3.xpose.msk.msra.mxu1 %vm942_vm1, %v1896_v11  ;;  %v5823_v11 = vld [vmem:[%s6484_s3 + $0x58] sm:$0xff] }
 0x230   : > { %4232 = vmatpush3.xpose.msk.msra.mxu0 %vm942_vm1, %v2059_v24  ;;  %4200 = vmatprep.subr.msk.mxu1 %vm942_vm1, %v1894_v54  ;;  %v2057_v28 = vpop.permute.xlu0 %2056  ;;  %v775_v38 = vmul.f32 %v5823_v11, %v5751_v53 }
 0x231   : > { %v1888_v62 = vpop.permute.xlu1 %1887  ;;  %4233 = vmatprep.subr.msk.mxu0 %vm942_vm1, %v2057_v28 }
 0x233   : > { %4201 = vmatpush3.xpose.msk.msra.mxu1 %vm942_vm1, %v1894_v54 }
 0x234   : > { %4234 = vmatpush3.xpose.msk.msra.mxu0 %vm942_vm1, %v2057_v28  ;;  %4202 = vmatprep.subr.msk.mxu1 %vm942_vm1, %v1892_v17  ;;  %v2055_v39 = vpop.permute.xlu0 %2054  ;;  %v5847_v28 = vld [vmem:[%s6484_s3 + $0x48] sm:$0xff] }
 0x235   : > { %4235 = vmatprep.subr.msk.mxu0 %vm942_vm1, %v2055_v39  ;;  %v1886_v50 = vpop.permute.xlu1 %1885 }
 0x237   : > { %4203 = vmatpush3.xpose.msk.msra.mxu1 %vm942_vm1, %v1892_v17  ;;  %v5837_v17 = vld [vmem:[%s6484_s3 + $0x50] sm:$0xff] }
 0x238   : > { %4236 = vmatpush3.xpose.msk.msra.mxu0 %vm942_vm1, %v2055_v39  ;;  %4204 = vmatprep.subr.msk.mxu1 %vm942_vm1, %v1890_v22  ;;  %v2053_v32 = vpop.permute.xlu0 %2052  ;;  %v774_v24 = vmul.f32 %v5837_v17, %v5768_v57  ;;  %v2269_v39 = vld [vmem:[%s6486_s5 + $0x30] sm:$0xff] }
 0x239   : > { %4237 = vmatprep.subr.msk.mxu0 %vm942_vm1, %v2053_v32  ;;  %v1884_v10 = vpop.permute.xlu1 %1883 }
 0x23b   : > { %4205 = vmatpush3.xpose.msk.msra.mxu1 %vm942_vm1, %v1890_v22  ;;  %v2270_v22 = vld [vmem:[%s6486_s5 + $0x38] sm:$0xff] }
 0x23c   : > { %4238 = vmatpush3.xpose.msk.msra.mxu0 %vm942_vm1, %v2053_v32  ;;  %4206 = vmatprep.subr.msk.mxu1 %vm942_vm1, %v1888_v62  ;;  %v2051_v61 = vpop.permute.xlu0 %2050 }
 0x23d   : > { %4239 = vmatprep.subr.msk.mxu0 %vm942_vm1, %v2051_v61  ;;  %v1882_v35 = vpop.permute.xlu1 %1881 }
 0x23f   : > { %4207 = vmatpush3.xpose.msk.msra.mxu1 %vm942_vm1, %v1888_v62  ;;  %v773_v62 = vmul.f32 %v5847_v28, %v5751_v53 }
 0x240   : > { %4240 = vmatpush3.xpose.msk.msra.mxu0 %vm942_vm1, %v2051_v61  ;;  %4208 = vmatprep.subr.msk.mxu1 %vm942_vm1, %v1886_v50  ;;  %v2049_v25 = vpop.permute.xlu0 %2048  ;;  %v5867_v61 = vld [vmem:[%s6484_s3 + $0x38] sm:$0xff] }
 0x241   : > { %4241 = vmatprep.subr.msk.mxu0 %vm942_vm1, %v2049_v25  ;;  %v1880_v26 = vpop.permute.xlu1 %1879 }
 0x243   : > { %4209 = vmatpush3.xpose.msk.msra.mxu1 %vm942_vm1, %v1886_v50  ;;  %v5857_v50 = vld [vmem:[%s6484_s3 + $0x40] sm:$0xff] }
 0x244   : > { %4242 = vmatpush3.xpose.msk.msra.mxu0 %vm942_vm1, %v2049_v25  ;;  %4210 = vmatprep.subr.msk.mxu1 %vm942_vm1, %v1884_v10  ;;  %v2047_v41 = vpop.permute.xlu0 %2046  ;;  %v772_v32 = vmul.f32 %v5857_v50, %v5768_v57  ;;  %v771_v25 = vmul.f32 %v5867_v61, %v5751_v53 }
 0x245   : > { %4243 = vmatprep.subr.msk.mxu0 %vm942_vm1, %v2047_v41  ;;  %v1878_v29 = vpop.permute.xlu1 %1877 }
 0x247   : > { %4211 = vmatpush3.xpose.msk.msra.mxu1 %vm942_vm1, %v1884_v10  ;;  %v2268_v10 = vld [vmem:[%s6486_s5 + $0x28] sm:$0xff] }
 0x248   : > { %4244 = vmatpush3.xpose.msk.msra.mxu0 %vm942_vm1, %v2047_v41  ;;  %4212 = vmatprep.subr.msk.mxu1 %vm942_vm1, %v1882_v35  ;;  %v2045_v2 = vpop.permute.xlu0 %2044  ;;  %v5877_v41 = vld [vmem:[%s6484_s3 + $0x30] sm:$0xff] }
 0x249   : > { %4245 = vmatprep.subr.msk.mxu0 %vm942_vm1, %v2045_v2  ;;  %v2039_v48 = vpop.permute.xlu1 %2038 }
 0x24b   : > { %4213 = vmatpush3.xpose.msk.msra.mxu1 %vm942_vm1, %v1882_v35  ;;  %v2267_v35 = vld [vmem:[%s6486_s5 + $0x20] sm:$0xff] }
 0x24c   : > { %4246 = vmatpush3.xpose.msk.msra.mxu0 %vm942_vm1, %v2045_v2  ;;  %4214 = vmatprep.subr.msk.mxu1 %vm942_vm1, %v1880_v26  ;;  %v2043_v3 = vpop.permute.xlu0 %2042  ;;  %v2266_v2 = vld [vmem:[%s6486_s5 + $0x18] sm:$0xff] }
 0x24d   : > { %4247 = vmatprep.subr.msk.mxu0 %vm942_vm1, %v2043_v3 }
 0x24f   : > { %4215 = vmatpush3.xpose.msk.msra.mxu1 %vm942_vm1, %v1880_v26  ;;  %v770_v26 = vmul.f32 %v5877_v41, %v5768_v57 }
 0x250   : > { %4248 = vmatpush3.xpose.msk.msra.mxu0 %vm942_vm1, %v2043_v3  ;;  %4216 = vmatprep.subr.msk.mxu1 %vm942_vm1, %v1878_v29  ;;  %v2041_v6 = vpop.permute.xlu0 %2040  ;;  %v5887_v3 = vld [vmem:[%s6484_s3 + $0x28] sm:$0xff] }
 0x251   : > { %v4010_v37 = vpop.f32.mrf.mxu1  ;;  %4249 = vmatprep.subr.msk.mxu0 %vm942_vm1, %v2041_v6 }
 0x252   : > { %v5744_v46 = vadd.f32 %v4010_v37, %v5733_v34  ;;  %v5897_v37 = vld [vmem:[%s6484_s3 + $0x20] sm:$0xff] }
 0x253   : > { %4217 = vmatpush3.xpose.msk.msra.mxu1 %vm942_vm1, %v1878_v29  ;;  %v1047_v55 = vpop.f32.mrf.mxu1  ;;  %v769_v29 = vmul.f32 %v5887_v3, %v5751_v53 }
 0x254   : > { %4250 = vmatpush3.xpose.msk.msra.mxu0 %vm942_vm1, %v2041_v6  ;;  %v5756_v12 = vadd.f32 %v1047_v55, %v5741_v40  ;;  %2185 = vmax.xlane.f32.xlu1 %v5744_v46  ;;  %v2265_v6 = vld [vmem:[%s6486_s5 + $0x10] sm:$0xff]  ;;  %v2264_v55 = vld [vmem:[%s6486_s5 + $0x8] sm:$0xff] }
 0x255   : > { %4251 = vmatprep.subr.msk.mxu0 %vm942_vm1, %v2039_v48  ;;  %4256 = vmatprep.subr.mxu1 %v2278_v9 }
 0x256   : > { %4219 = vmatmul.mubr.msk.f32.vlgmr.msra.gmra.mxu1 %vm942_vm1, %v5416_v13  ;;  %2183 = vmax.xlane.f32.xlu0 %v5756_v12 }
 0x257   : > { %4257 = vmatpush3.msra.mxu1 %v2278_v9  ;;  %v768_v9 = vmul.f32 %v5897_v37, %v5768_v57 }
 0x258   : > { %4252 = vmatpush3.xpose.msk.msra.mxu0 %vm942_vm1, %v2039_v48  ;;  %4258 = vmatprep.subr.mxu1 %v2277_v58  ;;  %v5906_v48 = vadd.f32 %v5061_v27, %v4953_v45  ;;  %v5921_v27 = vld [vmem:[%s6484_s3 + $0x10] sm:$0xff] }
 0x259   : > { %4312 = vmatprep.subr.mxu0 %v779_v15  ;;  %4259 = vmatpush3.msra.mxu1 %v2277_v58  ;;  %v5911_v58 = vld [vmem:[%s6484_s3 + $0x18] sm:$0xff] }
 0x25a   : > { %v4045_v13 = vpop.f32.mrf.mxu0  ;;  %4260 = vmatprep.subr.mxu1 %v2276_v56 }
 0x25b   : > { %4254 = vmatmul.mubr.msk.f32.vlgmr.msra.gmra.mxu0 %vm942_vm1, %v5441_v7  ;;  %4261 = vmatpush3.msra.mxu1 %v2276_v56  ;;  %v5802_v7 = vld [vmem:[%s6484_s3 + $0x68] sm:$0xff]  ;;  %v5828_v54 = vadd.f32 %v4045_v13, %v5733_v34  ;;  %v2263_v56 = vld [vmem:[%s6486_s5] sm:$0xff]  ;;  %v5927_v13 = vmul.f32 %v5773_v47, %v5906_v48 }
 0x25c   : > { %4313 = vmatpush3.msra.mxu0 %v779_v15  ;;  %v1208_v51 = vpop.f32.mrf.mxu0  ;;  %4262 = vmatprep.subr.mxu1 %v2275_v52  ;;  %v777_v8 = vmul.f32 %v5802_v7, %v5751_v53  ;;  %v767_v15 = vmul.f32 %v5911_v58, %v5751_v53 }
 0x25d   : > { %v5797_v5 = vadd.f32 %v1208_v51, %v5741_v40  ;;  %4314 = vmatprep.subr.mxu0 %v778_v44  ;;  %4263 = vmatpush3.msra.mxu1 %v2275_v52  ;;  %v766_v52 = vmul.f32 %v5921_v27, %v5768_v57 }
 0x25e   : > { %4315 = vmatpush3.msra.mxu0 %v778_v44  ;;  %4264 = vmatprep.subr.mxu1 %v2274_v18  ;;  %v5931_v44 = vadd.f32 %v5097_v43, %v4953_v45 }
 0x25f   : > { %4316 = vmatprep.subr.mxu0 %v777_v8  ;;  %2187 = vmax.xlane.f32.xlu0 %v5797_v5 }
 0x260   : > { %4265 = vmatpush3.msra.mxu1 %v2274_v18  ;;  %4317 = vmatpush3.msra.mxu0 %v777_v8  ;;  %v5936_v18 = vld [vmem:[%s6484_s3 + $0x8] sm:$0xff]  ;;  %v5944_v8 = vld [vmem:[%s6484_s3] sm:$0xff] }
 0x261   : > { %4266 = vmatprep.subr.mxu1 %v2273_v21  ;;  %4318 = vmatprep.subr.mxu0 %v776_v60  ;;  %v765_v51 = vmul.f32 %v5936_v18, %v5751_v53  ;;  %v764_v43 = vmul.f32 %v5944_v8, %v5768_v57 }
 0x262   : > { %4267 = vmatpush3.msra.mxu1 %v2273_v21  ;;  %4319 = vmatpush3.msra.mxu0 %v776_v60  ;;  %v811_v21 = vmul.f32 %v5773_v47, %v5931_v44 }
 0x263   : > { %4268 = vmatprep.subr.mxu1 %v2272_v31  ;;  %4320 = vmatprep.subr.mxu0 %v775_v38 }
 0x264   : > { %2189 = vmax.xlane.f32.xlu0 %v5828_v54  ;;  %4269 = vmatpush3.msra.mxu1 %v2272_v31 }
 0x265   : > { %4321 = vmatpush3.msra.mxu0 %v775_v38  ;;  %4270 = vmatprep.subr.mxu1 %v2271_v16 }
 0x266   : > { %4322 = vmatprep.subr.mxu0 %v774_v24  ;;  %4271 = vmatpush3.msra.mxu1 %v2271_v16 }
 0x267   : > { %4323 = vmatpush3.msra.mxu0 %v774_v24  ;;  %4272 = vmatprep.subr.mxu1 %v2270_v22 }
 0x268   : > { %4324 = vmatprep.subr.mxu0 %v773_v62  ;;  %4273 = vmatpush3.msra.mxu1 %v2270_v22 }
 0x269   : > { %4325 = vmatpush3.msra.mxu0 %v773_v62  ;;  %4274 = vmatprep.subr.mxu1 %v2269_v39 }
 0x26a   : > { %4326 = vmatprep.subr.mxu0 %v772_v32  ;;  %4275 = vmatpush3.msra.mxu1 %v2269_v39 }
 0x26b   : > { %4327 = vmatpush3.msra.mxu0 %v772_v32  ;;  %4276 = vmatprep.subr.mxu1 %v2268_v10 }
 0x26c   : > { %4328 = vmatprep.subr.mxu0 %v771_v25  ;;  %4277 = vmatpush3.msra.mxu1 %v2268_v10 }
 0x26d   : > { %4329 = vmatpush3.msra.mxu0 %v771_v25  ;;  %4278 = vmatprep.subr.mxu1 %v2267_v35 }
 0x26e   : > { %4330 = vmatprep.subr.mxu0 %v770_v26  ;;  %4279 = vmatpush3.msra.mxu1 %v2267_v35 }
 0x26f   : > { %4331 = vmatpush3.msra.mxu0 %v770_v26  ;;  %4280 = vmatprep.subr.mxu1 %v2266_v2 }
 0x270   : > { %4332 = vmatprep.subr.mxu0 %v769_v29  ;;  %4281 = vmatpush3.msra.mxu1 %v2266_v2 }
 0x271   : > { %4333 = vmatpush3.msra.mxu0 %v769_v29  ;;  %4282 = vmatprep.subr.mxu1 %v2265_v6 }
 0x272   : > { %4334 = vmatprep.subr.mxu0 %v768_v9  ;;  %4283 = vmatpush3.msra.mxu1 %v2265_v6 }
 0x273   : > { %4335 = vmatpush3.msra.mxu0 %v768_v9  ;;  %4284 = vmatprep.subr.mxu1 %v2264_v55 }
 0x274   : > { %4336 = vmatprep.subr.mxu0 %v767_v15  ;;  %4285 = vmatpush3.msra.mxu1 %v2264_v55 }
 0x275   : > { %4337 = vmatpush3.msra.mxu0 %v767_v15  ;;  %4286 = vmatprep.subr.mxu1 %v2263_v56 }
 0x276   : > { %4338 = vmatprep.subr.mxu0 %v766_v52  ;;  %4287 = vmatpush3.msra.mxu1 %v2263_v56 }
 0x277   : > { %4339 = vmatpush3.msra.mxu0 %v766_v52  ;;  %4347 = vmatprep.subr.mxu1 %v5927_v13 }
 0x278   : > { %4340 = vmatprep.subr.mxu0 %v765_v51 }
 0x279   : > { %4341 = vmatpush3.msra.mxu0 %v765_v51 }
 0x27a   : > { %4342 = vmatprep.subr.mxu0 %v764_v43 }
 0x27b   : > { %4343 = vmatpush3.msra.mxu0 %v764_v43 }
 0x27c   : > { %4382 = vmatprep.subr.mxu0 %v811_v21 }
 0x296   : > { %v4080_v53 = vpop.f32.mrf.mxu1 }
 0x297   : > { %v5951_v60 = vadd.f32 %v4080_v53, %v5733_v34 }
 0x298   : > { %v1369_v31 = vpop.f32.mrf.mxu1 }
 0x299   : > { %v5954_v38 = vadd.f32 %v1369_v31, %v5741_v40  ;;  %2193 = vmax.xlane.f32.xlu0 %v5951_v60 }
 0x29b   : > { %v4115_v16 = vpop.f32.mrf.mxu0  ;;  %2191 = vmax.xlane.f32.xlu1 %v5954_v38 }
 0x29c   : > { %v5959_v57 = vadd.f32 %v4115_v16, %v5733_v34  ;;  %v5992_v16 = vadd.f32 %v5081_v36, %v4953_v45  ;;  %v809_v36 = vmul.f32 %v5802_v7, %v5931_v44 }
 0x29d   : > { %v1530_v24 = vpop.f32.mrf.mxu0 }
 0x29e   : > { %v5962_v22 = vadd.f32 %v1530_v24, %v5741_v40  ;;  %2197 = vmax.xlane.f32.xlu0 %v5959_v57 }
 0x2a0   : > { %2195 = vmax.xlane.f32.xlu1 %v5962_v22 }
 0x2d6   : > { %v4150_v62 = vpop.f32.mrf.mxu1 }
 0x2d7   : > { %v5967_v39 = vadd.f32 %v4150_v62, %v5733_v34 }
 0x2d8   : > { %v1691_v32 = vpop.f32.mrf.mxu1 }
 0x2d9   : > { %v5970_v10 = vadd.f32 %v1691_v32, %v5741_v40  ;;  %2201 = vmax.xlane.f32.xlu0 %v5967_v39 }
 0x2db   : > { %v4185_v25 = vpop.f32.mrf.mxu0  ;;  %2199 = vmax.xlane.f32.xlu1 %v5970_v10 }
 0x2dc   : > { %v5975_v35 = vadd.f32 %v4185_v25, %v5733_v34  ;;  %v808_v25 = vmul.f32 %v5813_v19, %v5992_v16 }
 0x2dd   : > { %v1852_v26 = vpop.f32.mrf.mxu0  ;;  %v2186_v2 = vpop.xlane.xlu1 %2185 }
 0x2de   : > { %v5978_v29 = vadd.f32 %v1852_v26, %v5741_v40  ;;  %2205 = vmax.xlane.f32.xlu0 %v5975_v35  ;;  %v2216_v6 = vsub.f32 %v5744_v46, %v2186_v2  ;;  %v5988_v46 = vadd.f32 %v4989_v63, %v4953_v45  ;;  %v793_v63 = vmul.f32 %v5802_v7, %v5906_v48 }
 0x2df   : > { %v2184_v9 = vpop.xlane.xlu0 %2183  ;;  %v807_v26 = vmul.f32 %v5823_v11, %v5931_v44 }
 0x2e0   : > { %2203 = vmax.xlane.f32.xlu1 %v5978_v29  ;;  %v2215_v55 = vsub.f32 %v5756_v12, %v2184_v9  ;;  %v2233_v15 = vmul.f32 1.442695, %v2216_v6  ;;  %v792_v32 = vmul.f32 %v5813_v19, %v5988_v46  ;;  %v790_v2 = vmul.f32 %v5837_v17, %v5988_v46 }
 0x2e1   : > { %v806_v6 = vmul.f32 %v5837_v17, %v5992_v16  ;;  %v789_v9 = vmul.f32 %v5847_v28, %v5906_v48 }
 0x2e2   : > { %v2231_v56 = vmul.f32 1.442695, %v2215_v55  ;;  %v805_v55 = vmul.f32 %v5847_v28, %v5931_v44 }
 0x2e4   : > { %4642 = vpow2.f32 %v2231_v56  ;;  %v788_v56 = vmul.f32 %v5857_v50, %v5988_v46 }
 0x2e5   : > { %4644 = vpow2.f32 %v2233_v15 }
 0x2e8   : > { %v2188_v52 = vpop.xlane.xlu0 %2187 }
 0x2e9   : > { %v2217_v51 = vsub.f32 %v5797_v5, %v2188_v52  ;;  %v794_v5 = vmul.f32 %v5789_v4, %v5988_v46  ;;  %v804_v52 = vmul.f32 %v5857_v50, %v5992_v16 }
 0x2eb   : > { %v2235_v43 = vmul.f32 1.442695, %v2217_v51  ;;  %v787_v51 = vmul.f32 %v5867_v61, %v5906_v48 }
 0x2ed   : > { %4646 = vpow2.f32 %v2235_v43  ;;  %v2190_v53 = vpop.xlane.xlu0 %2189  ;;  %v803_v43 = vmul.f32 %v5867_v61, %v5931_v44 }
 0x2ee   : > { %v2218_v31 = vsub.f32 %v5828_v54, %v2190_v53  ;;  %v810_v54 = vmul.f32 %v5789_v4, %v5992_v16  ;;  %v786_v53 = vmul.f32 %v5877_v41, %v5988_v46 }
 0x2f0   : > { %v2237_v12 = vmul.f32 1.442695, %v2218_v31  ;;  %v802_v31 = vmul.f32 %v5877_v41, %v5992_v16 }
 0x2f1   : > { %v4643_v24 = vpop.eup %4642 }
 0x2f2   : > { %v4645_v62 = vpop.eup %4644  ;;  %4648 = vpow2.f32 %v2237_v12  ;;  %4288 = vmatprep.mubr.f32.mxu1 %v4643_v24  ;;  %4344 = vmatprep.mubr.f32.mxu0 %v4643_v24  ;;  %v785_v12 = vmul.f32 %v5887_v3, %v5906_v48  ;;  %v801_v24 = vmul.f32 %v5887_v3, %v5931_v44 }
 0x2f3   : > { %4289 = vmatmul.mubr.f32.vlgmr.msra.gmra.mxu1 %v4645_v62  ;;  %4345 = vmatmul.mubr.f32.vlgmr.msra.gmra.mxu0 %v4645_v62  ;;  %v784_v62 = vmul.f32 %v5897_v37, %v5988_v46 }
 0x2f4   : > { %4348 = vmatpush3.msra.mxu1 %v5927_v13  ;;  %4383 = vmatpush3.msra.mxu0 %v811_v21  ;;  %v791_v13 = vmul.f32 %v5823_v11, %v5906_v48 }
 0x2f5   : > { %4349 = vmatprep.subr.mxu1 %v794_v5  ;;  %4384 = vmatprep.subr.mxu0 %v810_v54 }
 0x2f6   : > { %4350 = vmatpush3.msra.mxu1 %v794_v5  ;;  %4385 = vmatpush3.msra.mxu0 %v810_v54  ;;  %v800_v5 = vmul.f32 %v5897_v37, %v5992_v16  ;;  %v783_v54 = vmul.f32 %v5911_v58, %v5906_v48 }
 0x2f7   : > { %4351 = vmatprep.subr.mxu1 %v793_v63  ;;  %4386 = vmatprep.subr.mxu0 %v809_v36 }
 0x2f8   : > { %4352 = vmatpush3.msra.mxu1 %v793_v63  ;;  %4387 = vmatpush3.msra.mxu0 %v809_v36  ;;  %v799_v63 = vmul.f32 %v5911_v58, %v5931_v44  ;;  %v782_v36 = vmul.f32 %v5921_v27, %v5988_v46 }
 0x2f9   : > { %4353 = vmatprep.subr.mxu1 %v792_v32  ;;  %4388 = vmatprep.subr.mxu0 %v808_v25 }
 0x2fa   : > { %v6009_v21 = vpop.eup %4646  ;;  %4354 = vmatpush3.msra.mxu1 %v792_v32  ;;  %4389 = vmatpush3.msra.mxu0 %v808_v25  ;;  %v798_v32 = vmul.f32 %v5921_v27, %v5992_v16  ;;  %v6055_v25 = vadd.f32 %v5185_v33, %v4953_v45  ;;  %v780_v33 = vmul.f32 %v5944_v8, %v5988_v46 }
 0x2fb   : > { %4291 = vmatprep.mubr.f32.mxu1 %v6009_v21  ;;  %4355 = vmatprep.subr.mxu1 %v791_v13 }
 0x2fc   : > { %4390 = vmatprep.subr.mxu0 %v807_v26  ;;  %4356 = vmatpush3.msra.mxu1 %v791_v13  ;;  %v6059_v13 = vadd.f32 %v5211_v1, %v4953_v45  ;;  %v6071_v1 = vmul.f32 %v5773_v47, %v6055_v25 }
 0x2fd   : > { %4391 = vmatpush3.msra.mxu0 %v807_v26  ;;  %4357 = vmatprep.subr.mxu1 %v790_v2  ;;  %v781_v26 = vmul.f32 %v5936_v18, %v5906_v48 }
 0x2fe   : > { %4392 = vmatprep.subr.mxu0 %v806_v6  ;;  %4358 = vmatpush3.msra.mxu1 %v790_v2  ;;  %v797_v2 = vmul.f32 %v5936_v18, %v5931_v44  ;;  %v843_v48 = vmul.f32 %v5773_v47, %v6059_v13 }
 0x2ff   : > { %v6022_v15 = vpop.eup %4648  ;;  %4393 = vmatpush3.msra.mxu0 %v806_v6  ;;  %4359 = vmatprep.subr.mxu1 %v789_v9  ;;  %v796_v6 = vmul.f32 %v5944_v8, %v5992_v16 }
 0x300   : > { %4292 = vmatmul.mubr.f32.gmra.mxu1 %v6022_v15  ;;  %4394 = vmatprep.subr.mxu0 %v805_v55 }
 0x301   : > { %4360 = vmatpush3.msra.mxu1 %v789_v9  ;;  %4395 = vmatpush3.msra.mxu0 %v805_v55 }
 0x302   : > { %4361 = vmatprep.subr.mxu1 %v788_v56  ;;  %4396 = vmatprep.subr.mxu0 %v804_v52 }
 0x303   : > { %4362 = vmatpush3.msra.mxu1 %v788_v56  ;;  %4397 = vmatpush3.msra.mxu0 %v804_v52 }
 0x304   : > { %4363 = vmatprep.subr.mxu1 %v787_v51  ;;  %4398 = vmatprep.subr.mxu0 %v803_v43 }
 0x305   : > { %4364 = vmatpush3.msra.mxu1 %v787_v51  ;;  %4399 = vmatpush3.msra.mxu0 %v803_v43 }
 0x306   : > { %4365 = vmatprep.subr.mxu1 %v786_v53  ;;  %4400 = vmatprep.subr.mxu0 %v802_v31 }
 0x307   : > { %4366 = vmatpush3.msra.mxu1 %v786_v53  ;;  %4401 = vmatpush3.msra.mxu0 %v802_v31 }
 0x308   : > { %4367 = vmatprep.subr.mxu1 %v785_v12  ;;  %4402 = vmatprep.subr.mxu0 %v801_v24 }
 0x309   : > { %4368 = vmatpush3.msra.mxu1 %v785_v12  ;;  %4403 = vmatpush3.msra.mxu0 %v801_v24 }
 0x30a   : > { %4369 = vmatprep.subr.mxu1 %v784_v62  ;;  %4404 = vmatprep.subr.mxu0 %v800_v5 }
 0x30b   : > { %4370 = vmatpush3.msra.mxu1 %v784_v62  ;;  %4405 = vmatpush3.msra.mxu0 %v800_v5 }
 0x30c   : > { %4371 = vmatprep.subr.mxu1 %v783_v54  ;;  %4406 = vmatprep.subr.mxu0 %v799_v63 }
 0x30d   : > { %4372 = vmatpush3.msra.mxu1 %v783_v54  ;;  %4407 = vmatpush3.msra.mxu0 %v799_v63 }
 0x30e   : > { %4373 = vmatprep.subr.mxu1 %v782_v36  ;;  %4408 = vmatprep.subr.mxu0 %v798_v32 }
 0x30f   : > { %4374 = vmatpush3.msra.mxu1 %v782_v36  ;;  %4409 = vmatpush3.msra.mxu0 %v798_v32 }
 0x310   : > { %4375 = vmatprep.subr.mxu1 %v781_v26  ;;  %4410 = vmatprep.subr.mxu0 %v797_v2 }
 0x311   : > { %4376 = vmatpush3.msra.mxu1 %v781_v26  ;;  %4411 = vmatpush3.msra.mxu0 %v797_v2 }
 0x312   : > { %4377 = vmatprep.subr.mxu1 %v780_v33  ;;  %4412 = vmatprep.subr.mxu0 %v796_v6 }
 0x313   : > { %4378 = vmatpush3.msra.mxu1 %v780_v33  ;;  %4413 = vmatpush3.msra.mxu0 %v796_v6  ;;  %v839_v33 = vmul.f32 %v5823_v11, %v6059_v13 }
 0x314   : > { %4417 = vmatprep.subr.mxu1 %v6071_v1  ;;  %4452 = vmatprep.subr.mxu0 %v843_v48 }
 0x316   : > { %v4220_v44 = vpop.f32.mrf.mxu1 }
 0x317   : > { %v6077_v46 = vadd.f32 %v4220_v44, %v5733_v34 }
 0x318   : > { %v2013_v16 = vpop.f32.mrf.mxu1 }
 0x319   : > { %v6080_v9 = vadd.f32 %v2013_v16, %v5741_v40  ;;  %2209 = vmax.xlane.f32.xlu0 %v6077_v46  ;;  %v835_v16 = vmul.f32 %v5867_v61, %v6059_v13 }
 0x31b   : > { %v4255_v55 = vpop.f32.mrf.mxu0  ;;  %2207 = vmax.xlane.f32.xlu1 %v6080_v9 }
 0x31c   : > { %v6085_v56 = vadd.f32 %v4255_v55, %v5733_v34 }
 0x31d   : > { %v2174_v52 = vpop.f32.mrf.mxu0 }
 0x31e   : > { %v6088_v51 = vadd.f32 %v2174_v52, %v5741_v40  ;;  %2213 = vmax.xlane.f32.xlu0 %v6085_v56  ;;  %v833_v52 = vmul.f32 %v5887_v3, %v6059_v13 }
 0x320   : > { %2211 = vmax.xlane.f32.xlu1 %v6088_v51 }
 0x322   : > { %v2194_v43 = vpop.xlane.xlu0 %2193 }
 0x323   : > { %v2220_v53 = vsub.f32 %v5951_v60, %v2194_v43  ;;  %v512_v60 = vadd.f32 %v5199_v42, %v4953_v45 }
 0x324   : > { %v2192_v31 = vpop.xlane.xlu1 %2191 }
 0x325   : > { %v2219_v12 = vsub.f32 %v5954_v38, %v2192_v31  ;;  %v2241_v24 = vmul.f32 1.442695, %v2220_v53  ;;  %v842_v38 = vmul.f32 %v5789_v4, %v512_v60  ;;  %v840_v42 = vmul.f32 %v5813_v19, %v512_v60 }
 0x326   : > { %v838_v6 = vmul.f32 %v5837_v17, %v512_v60  ;;  %v836_v44 = vmul.f32 %v5857_v50, %v512_v60  ;;  %v834_v55 = vmul.f32 %v5877_v41, %v512_v60  ;;  %v832_v43 = vmul.f32 %v5897_v37, %v512_v60 }
 0x327   : > { %v2239_v62 = vmul.f32 1.442695, %v2219_v12  ;;  %v2198_v5 = vpop.xlane.xlu0 %2197  ;;  %v831_v53 = vmul.f32 %v5911_v58, %v6059_v13  ;;  %v830_v31 = vmul.f32 %v5921_v27, %v512_v60  ;;  %v6125_v12 = vadd.f32 %v5387_v49, %v4953_v45 }
 0x328   : > { %v2222_v34 = vsub.f32 %v5959_v57, %v2198_v5  ;;  %v841_v57 = vmul.f32 %v5802_v7, %v6059_v13 }
 0x329   : > { %4650 = vpow2.f32 %v2239_v62  ;;  %v2196_v54 = vpop.xlane.xlu1 %2195  ;;  %v828_v62 = vmul.f32 %v5944_v8, %v512_v60  ;;  %v875_v5 = vmul.f32 %v5773_v47, %v6125_v12 }
 0x32a   : > { %4652 = vpow2.f32 %v2241_v24  ;;  %v2221_v40 = vsub.f32 %v5962_v22, %v2196_v54  ;;  %v2245_v63 = vmul.f32 1.442695, %v2222_v34  ;;  %v829_v24 = vmul.f32 %v5936_v18, %v6059_v13 }
 0x32c   : > { %v2243_v36 = vmul.f32 1.442695, %v2221_v40 }
 0x32e   : > { %4654 = vpow2.f32 %v2243_v36 }
 0x32f   : > { %4656 = vpow2.f32 %v2245_v63 }
 0x336   : > { %v4651_v32 = vpop.eup %4650 }
 0x337   : > { %v4653_v26 = vpop.eup %4652  ;;  %4294 = vmatprep.mubr.f32.mxu1 %v4651_v32  ;;  %4414 = vmatprep.mubr.f32.mxu0 %v4651_v32 }
 0x338   : > { %4295 = vmatmul.mubr.f32.gmra.mxu1 %v4653_v26  ;;  %4415 = vmatmul.mubr.f32.vlgmr.msra.gmra.mxu0 %v4653_v26 }
 0x339   : > { %4453 = vmatpush3.msra.mxu0 %v843_v48  ;;  %v837_v48 = vmul.f32 %v5847_v28, %v6059_v13 }
 0x33a   : > { %4454 = vmatprep.subr.mxu0 %v842_v38 }
 0x33b   : > { %v6101_v22 = vpop.eup %4654  ;;  %4455 = vmatpush3.msra.mxu0 %v842_v38 }
 0x33c   : > { %v6103_v2 = vpop.eup %4656  ;;  %4297 = vmatprep.mubr.f32.mxu1 %v6101_v22  ;;  %4456 = vmatprep.subr.mxu0 %v841_v57 }
 0x33d   : > { %4298 = vmatmul.mubr.f32.gmra.mxu1 %v6103_v2  ;;  %4457 = vmatpush3.msra.mxu0 %v841_v57 }
 0x33e   : > { %4458 = vmatprep.subr.mxu0 %v840_v42 }
 0x33f   : > { %4459 = vmatpush3.msra.mxu0 %v840_v42 }
 0x340   : > { %4460 = vmatprep.subr.mxu0 %v839_v33 }
 0x341   : > { %4461 = vmatpush3.msra.mxu0 %v839_v33 }
 0x342   : > { %4462 = vmatprep.subr.mxu0 %v838_v6 }
 0x343   : > { %4463 = vmatpush3.msra.mxu0 %v838_v6  ;;  %v871_v6 = vmul.f32 %v5823_v11, %v6125_v12 }
 0x344   : > { %4464 = vmatprep.subr.mxu0 %v837_v48 }
 0x345   : > { %4465 = vmatpush3.msra.mxu0 %v837_v48 }
 0x346   : > { %4466 = vmatprep.subr.mxu0 %v836_v44 }
 0x347   : > { %4467 = vmatpush3.msra.mxu0 %v836_v44  ;;  %v869_v44 = vmul.f32 %v5847_v28, %v6125_v12 }
 0x348   : > { %4468 = vmatprep.subr.mxu0 %v835_v16 }
 0x349   : > { %4469 = vmatpush3.msra.mxu0 %v835_v16 }
 0x34a   : > { %4470 = vmatprep.subr.mxu0 %v834_v55 }
 0x34b   : > { %4471 = vmatpush3.msra.mxu0 %v834_v55  ;;  %v867_v55 = vmul.f32 %v5867_v61, %v6125_v12 }
 0x34c   : > { %4472 = vmatprep.subr.mxu0 %v833_v52 }
 0x34d   : > { %4473 = vmatpush3.msra.mxu0 %v833_v52 }
 0x34e   : > { %4474 = vmatprep.subr.mxu0 %v832_v43 }
 0x34f   : > { %4475 = vmatpush3.msra.mxu0 %v832_v43  ;;  %v865_v43 = vmul.f32 %v5887_v3, %v6125_v12 }
 0x350   : > { %4476 = vmatprep.subr.mxu0 %v831_v53 }
 0x351   : > { %4477 = vmatpush3.msra.mxu0 %v831_v53 }
 0x352   : > { %4478 = vmatprep.subr.mxu0 %v830_v31 }
 0x353   : > { %4479 = vmatpush3.msra.mxu0 %v830_v31  ;;  %v863_v31 = vmul.f32 %v5911_v58, %v6125_v12 }
 0x354   : > { %4480 = vmatprep.subr.mxu0 %v829_v24 }
 0x355   : > { %4481 = vmatpush3.msra.mxu0 %v829_v24 }
 0x356   : > { %4482 = vmatprep.subr.mxu0 %v828_v62 }
 0x357   : > { %4483 = vmatpush3.msra.mxu0 %v828_v62  ;;  %v861_v62 = vmul.f32 %v5936_v18, %v6125_v12 }
 0x358   : > { %4522 = vmatprep.subr.mxu0 %v875_v5 }
 0x362   : > { %v2202_v34 = vpop.xlane.xlu0 %2201 }
 0x363   : > { %v2224_v54 = vsub.f32 %v5967_v39, %v2202_v34  ;;  %v536_v39 = vadd.f32 %v5366_v23, %v4953_v45  ;;  %v3031_v34 = vld [vmem:[%s6487_s6 + $0x38] sm:$0xff] }
 0x364   : > { %v2200_v49 = vpop.xlane.xlu1 %2199 }
 0x365   : > { %v2223_v40 = vsub.f32 %v5970_v10, %v2200_v49  ;;  %v2249_v63 = vmul.f32 1.442695, %v2224_v54  ;;  %v874_v10 = vmul.f32 %v5789_v4, %v536_v39  ;;  %v872_v23 = vmul.f32 %v5813_v19, %v536_v39 }
 0x366   : > { %v870_v48 = vmul.f32 %v5837_v17, %v536_v39  ;;  %v868_v16 = vmul.f32 %v5857_v50, %v536_v39  ;;  %v866_v52 = vmul.f32 %v5877_v41, %v536_v39  ;;  %v864_v53 = vmul.f32 %v5897_v37, %v536_v39 }
 0x367   : > { %v2247_v36 = vmul.f32 1.442695, %v2223_v40  ;;  %v2206_v13 = vpop.xlane.xlu0 %2205  ;;  %v862_v24 = vmul.f32 %v5921_v27, %v536_v39 }
 0x368   : > { %v2226_v32 = vsub.f32 %v5975_v35, %v2206_v13  ;;  %v873_v35 = vmul.f32 %v5802_v7, %v6125_v12 }
 0x369   : > { %4658 = vpow2.f32 %v2247_v36  ;;  %v2204_v60 = vpop.xlane.xlu1 %2203 }
 0x36a   : > { %4660 = vpow2.f32 %v2249_v63  ;;  %v2225_v26 = vsub.f32 %v5978_v29, %v2204_v60  ;;  %v2253_v38 = vmul.f32 1.442695, %v2226_v32 }
 0x36c   : > { %v2251_v47 = vmul.f32 1.442695, %v2225_v26 }
 0x36e   : > { %4662 = vpow2.f32 %v2251_v47 }
 0x36f   : > { %4664 = vpow2.f32 %v2253_v38 }
 0x376   : > { %v4659_v57 = vpop.eup %4658 }
 0x377   : > { %v4661_v42 = vpop.eup %4660  ;;  %4300 = vmatprep.mubr.f32.mxu1 %v4659_v57  ;;  %4484 = vmatprep.mubr.f32.mxu0 %v4659_v57 }
 0x378   : > { %4301 = vmatmul.mubr.f32.gmra.mxu1 %v4661_v42  ;;  %4485 = vmatmul.mubr.f32.vlgmr.msra.gmra.mxu0 %v4661_v42 }
 0x379   : > { %4523 = vmatpush3.msra.mxu0 %v875_v5  ;;  %v860_v5 = vmul.f32 %v5944_v8, %v536_v39 }
 0x37a   : > { %4524 = vmatprep.subr.mxu0 %v874_v10 }
 0x37b   : > { %v6141_v29 = vpop.eup %4662  ;;  %4525 = vmatpush3.msra.mxu0 %v874_v10  ;;  %v3028_v10 = vld [vmem:[%s6487_s6 + $0x20] sm:$0xff] }
 0x37c   : > { %v6143_v33 = vpop.eup %4664  ;;  %4303 = vmatprep.mubr.f32.mxu1 %v6141_v29  ;;  %4526 = vmatprep.subr.mxu0 %v873_v35 }
 0x37d   : > { %4304 = vmatmul.mubr.f32.gmra.mxu1 %v6143_v33  ;;  %4527 = vmatpush3.msra.mxu0 %v873_v35 }
 0x37e   : > { %4528 = vmatprep.subr.mxu0 %v872_v23 }
 0x37f   : > { %4529 = vmatpush3.msra.mxu0 %v872_v23  ;;  %v6190_v23 = vadd.f32 %v5117_v59, %v4953_v45 }
 0x380   : > { %4530 = vmatprep.subr.mxu0 %v871_v6 }
 0x381   : > { %4531 = vmatpush3.msra.mxu0 %v871_v6  ;;  %v3027_v6 = vld [vmem:[%s6487_s6 + $0x18] sm:$0xff]  ;;  %v826_v59 = vmul.f32 %v5789_v4, %v6190_v23  ;;  %v824_v4 = vmul.f32 %v5813_v19, %v6190_v23 }
 0x382   : > { %4532 = vmatprep.subr.mxu0 %v870_v48 }
 0x383   : > { %4533 = vmatpush3.msra.mxu0 %v870_v48  ;;  %v3026_v48 = vld [vmem:[%s6487_s6 + $0x10] sm:$0xff] }
 0x384   : > { %4534 = vmatprep.subr.mxu0 %v869_v44 }
 0x385   : > { %4535 = vmatpush3.msra.mxu0 %v869_v44  ;;  %v825_v44 = vmul.f32 %v5802_v7, %v6055_v25 }
 0x386   : > { %4536 = vmatprep.subr.mxu0 %v868_v16 }
 0x387   : > { %4537 = vmatpush3.msra.mxu0 %v868_v16  ;;  %v821_v16 = vmul.f32 %v5847_v28, %v6055_v25 }
 0x388   : > { %4538 = vmatprep.subr.mxu0 %v867_v55 }
 0x389   : > { %4539 = vmatpush3.msra.mxu0 %v867_v55  ;;  %v820_v55 = vmul.f32 %v5857_v50, %v6190_v23 }
 0x38a   : > { %4540 = vmatprep.subr.mxu0 %v866_v52 }
 0x38b   : > { %4541 = vmatpush3.msra.mxu0 %v866_v52  ;;  %v819_v52 = vmul.f32 %v5867_v61, %v6055_v25 }
 0x38c   : > { %4542 = vmatprep.subr.mxu0 %v865_v43 }
 0x38d   : > { %4543 = vmatpush3.msra.mxu0 %v865_v43  ;;  %v818_v43 = vmul.f32 %v5877_v41, %v6190_v23 }
 0x38e   : > { %4544 = vmatprep.subr.mxu0 %v864_v53 }
 0x38f   : > { %4545 = vmatpush3.msra.mxu0 %v864_v53  ;;  %v817_v53 = vmul.f32 %v5887_v3, %v6055_v25 }
 0x390   : > { %4546 = vmatprep.subr.mxu0 %v863_v31 }
 0x391   : > { %4547 = vmatpush3.msra.mxu0 %v863_v31  ;;  %v816_v31 = vmul.f32 %v5897_v37, %v6190_v23 }
 0x392   : > { %4548 = vmatprep.subr.mxu0 %v862_v24 }
 0x393   : > { %4549 = vmatpush3.msra.mxu0 %v862_v24  ;;  %v815_v24 = vmul.f32 %v5911_v58, %v6055_v25 }
 0x394   : > { %4550 = vmatprep.subr.mxu0 %v861_v62 }
 0x395   : > { %4551 = vmatpush3.msra.mxu0 %v861_v62  ;;  %v814_v62 = vmul.f32 %v5921_v27, %v6190_v23 }
 0x396   : > { %4552 = vmatprep.subr.mxu0 %v860_v5 }
 0x397   : > { %4553 = vmatpush3.msra.mxu0 %v860_v5  ;;  %v530_v5 = vadd.f32 %v5344_v0, %v4953_v45  ;;  %v4723_v0 = vld [vmem:[%s6484_s3 + $0x70] sm:$0xff] }
 0x398   : > { %4592 = vmatprep.subr.mxu0 %v3031_v34 }
 0x3a2   : > { %v2210_v54 = vpop.xlane.xlu0 %2209 }
 0x3a3   : > { %v2228_v49 = vsub.f32 %v6077_v46, %v2210_v54  ;;  %v524_v54 = vadd.f32 %v5236_v20, %v4953_v45 }
 0x3a4   : > { %v2208_v40 = vpop.xlane.xlu1 %2207 }
 0x3a5   : > { %v2227_v63 = vsub.f32 %v6080_v9, %v2208_v40  ;;  %v2257_v36 = vmul.f32 1.442695, %v2228_v49  ;;  %v3030_v9 = vld [vmem:[%s6487_s6 + $0x30] sm:$0xff]  ;;  %v812_v49 = vmul.f32 %v5944_v8, %v6190_v23  ;;  %v4722_v40 = vld [vmem:[%s6484_s3 + $0x78] sm:$0xff]  ;;  %v858_v20 = vmul.f32 %v4723_v0, %v524_v54 }
 0x3a7   : > { %v2255_v12 = vmul.f32 1.442695, %v2227_v63  ;;  %v2214_v13 = vpop.xlane.xlu0 %2213  ;;  %v859_v63 = vmul.f32 %v4722_v40, %v530_v5 }
 0x3a8   : > { %v2230_v32 = vsub.f32 %v6085_v56, %v2214_v13  ;;  %v3029_v56 = vld [vmem:[%s6487_s6 + $0x28] sm:$0xff]  ;;  %v853_v13 = vmul.f32 %v5847_v28, %v530_v5  ;;  %v848_v28 = vmul.f32 %v5897_v37, %v524_v54  ;;  %v6271_v37 = vadd.f32 %v5418_v14, %v4953_v45 }
 0x3a9   : > { %4666 = vpow2.f32 %v2255_v12  ;;  %v2212_v60 = vpop.xlane.xlu1 %2211  ;;  %v854_v12 = vmul.f32 %v5837_v17, %v524_v54 }
 0x3aa   : > { %4668 = vpow2.f32 %v2257_v36  ;;  %v2229_v26 = vsub.f32 %v6088_v51, %v2212_v60  ;;  %v2261_v38 = vmul.f32 1.442695, %v2230_v32  ;;  %v856_v36 = vmul.f32 %v5813_v19, %v524_v54  ;;  %v4727_v32 = vld [vmem:[%s6484_s3 + $0x50] sm:$0xff] }
 0x3ab   : > { %v851_v19 = vmul.f32 %v5867_v61, %v530_v5  ;;  %v846_v61 = vmul.f32 %v5921_v27, %v524_v54  ;;  %v886_v60 = vmul.f32 %v4727_v32, %v6271_v37 }
 0x3ac   : > { %v2259_v47 = vmul.f32 1.442695, %v2229_v26  ;;  %v4728_v26 = vld [vmem:[%s6484_s3 + $0x48] sm:$0xff] }
 0x3ae   : > { %4670 = vpow2.f32 %v2259_v47  ;;  %v4729_v47 = vld [vmem:[%s6484_s3 + $0x40] sm:$0xff] }
 0x3af   : > { %4672 = vpow2.f32 %v2261_v38 }
 0x3b3   : > { %v4346_v39 = vpop.f32.mrf.mxu0 }
 0x3b5   : > { %v2490_v42 = vpop.f32.mrf.mxu0 }
 0x3b6   : > { %v4667_v57 = vpop.eup %4666 }
 0x3b7   : > { %v4669_v46 = vpop.eup %4668  ;;  %4306 = vmatprep.mubr.f32.mxu1 %v4667_v57  ;;  %4554 = vmatprep.mubr.f32.mxu0 %v4667_v57  ;;  %v4730_v57 = vld [vmem:[%s6484_s3 + $0x38] sm:$0xff] }
 0x3b8   : > { %4307 = vmatmul.mubr.f32.gmra.mxu1 %v4669_v46  ;;  %4555 = vmatmul.mubr.f32.vlgmr.msra.gmra.mxu0 %v4669_v46 }
 0x3b9   : > { %4593 = vmatpush3.msra.mxu0 %v3031_v34  ;;  %4608 = vmatprep.mubr.msk.f32.mxu0 %vm942_vm1, %v2490_v42  ;;  %v813_v34 = vmul.f32 %v5936_v18, %v6055_v25 }
 0x3ba   : > { %4594 = vmatprep.subr.mxu0 %v3030_v9 }
 0x3bb   : > { %v6180_v51 = vpop.eup %4670  ;;  %4595 = vmatpush3.msra.mxu0 %v3030_v9  ;;  %v4731_v9 = vld [vmem:[%s6484_s3 + $0x30] sm:$0xff] }
 0x3bc   : > { %v6185_v35 = vpop.eup %4672  ;;  %4309 = vmatprep.mubr.f32.mxu1 %v6180_v51  ;;  %4596 = vmatprep.subr.mxu0 %v3029_v56  ;;  %v882_v42 = vmul.f32 %v4731_v9, %v6271_v37 }
 0x3bd   : > { %4310 = vmatmul.mubr.f32.gmra.mxu1 %v6185_v35  ;;  %4597 = vmatpush3.msra.mxu0 %v3029_v56  ;;  %v4732_v56 = vld [vmem:[%s6484_s3 + $0x28] sm:$0xff] }
 0x3be   : > { %4379 = vmatprep.mubr.f32.mxu1 %v6009_v21  ;;  %4598 = vmatprep.subr.mxu0 %v3028_v10  ;;  %v3025_v21 = vld [vmem:[%s6487_s6 + $0x8] sm:$0xff] }
 0x3bf   : > { %4599 = vmatpush3.msra.mxu0 %v3028_v10  ;;  %v4733_v10 = vld [vmem:[%s6484_s3 + $0x20] sm:$0xff] }
 0x3c0   : > { %4600 = vmatprep.subr.mxu0 %v3027_v6 }
 0x3c1   : > { %4380 = vmatmul.mubr.f32.vlgmr.msra.gmra.mxu1 %v6022_v15  ;;  %4601 = vmatpush3.msra.mxu0 %v3027_v6  ;;  %v3024_v15 = vld [vmem:[%s6487_s6] sm:$0xff]  ;;  %v4734_v6 = vld [vmem:[%s6484_s3 + $0x18] sm:$0xff] }
 0x3c2   : > { %4418 = vmatpush3.msra.mxu1 %v6071_v1  ;;  %4449 = vmatprep.mubr.f32.mxu1 %v6101_v22  ;;  %v823_v1 = vmul.f32 %v5823_v11, %v6055_v25  ;;  %v822_v22 = vmul.f32 %v5837_v17, %v6190_v23  ;;  %v857_v25 = vmul.f32 %v5802_v7, %v530_v5 }
 0x3c3   : > { %4419 = vmatprep.subr.mxu1 %v826_v59  ;;  %4602 = vmatprep.subr.mxu0 %v3026_v48  ;;  %v852_v7 = vmul.f32 %v5857_v50, %v524_v54  ;;  %v849_v17 = vmul.f32 %v5887_v3, %v530_v5  ;;  %v847_v50 = vmul.f32 %v5911_v58, %v530_v5 }
 0x3c4   : > { %4420 = vmatpush3.msra.mxu1 %v826_v59  ;;  %4603 = vmatpush3.msra.mxu0 %v3026_v48  ;;  %v845_v3 = vmul.f32 %v5936_v18, %v530_v5  ;;  %v844_v58 = vmul.f32 %v5944_v8, %v524_v54  ;;  %v4725_v18 = vld [vmem:[%s6484_s3 + $0x60] sm:$0xff]  ;;  %v880_v23 = vmul.f32 %v4733_v10, %v6271_v37  ;;  %v4735_v59 = vld [vmem:[%s6484_s3 + $0x10] sm:$0xff] }
 0x3c5   : > { %4421 = vmatprep.subr.mxu1 %v825_v44  ;;  %4604 = vmatprep.subr.mxu0 %v3025_v21  ;;  %v888_v8 = vmul.f32 %v4725_v18, %v6271_v37 }
 0x3c6   : > { %4422 = vmatpush3.msra.mxu1 %v825_v44  ;;  %4605 = vmatpush3.msra.mxu0 %v3025_v21  ;;  %v878_v21 = vmul.f32 %v4735_v59, %v6271_v37  ;;  %v4736_v44 = vld [vmem:[%s6484_s3 + $0x8] sm:$0xff] }
 0x3c7   : > { %4423 = vmatprep.subr.mxu1 %v824_v4  ;;  %4606 = vmatprep.subr.mxu0 %v3024_v15 }
 0x3c8   : > { %4424 = vmatpush3.msra.mxu1 %v824_v4  ;;  %4607 = vmatpush3.msra.mxu0 %v3024_v15  ;;  %v4737_v4 = vld [vmem:[%s6484_s3] sm:$0xff] }
 0x3c9   : > { %4425 = vmatprep.subr.mxu1 %v823_v1  ;;  %4609 = vmatmul.mubr.msk.f32.vlgmr.msra.gmra.mxu0 %vm942_vm1, %v4346_v39  ;;  %v884_v39 = vmul.f32 %v4729_v47, %v6271_v37 }
 0x3ca   : > { %4426 = vmatpush3.msra.mxu1 %v823_v1  ;;  %v876_v1 = vmul.f32 %v4737_v4, %v6271_v37 }
 0x3cb   : > { %4427 = vmatprep.subr.mxu1 %v822_v22 }
 0x3cc   : > { %4428 = vmatpush3.msra.mxu1 %v822_v22  ;;  %v4290_v22 = vpop.f32.mrf.mxu1 }
 0x3cd   : > { %4429 = vmatprep.subr.mxu1 %v821_v16  ;;  %4674 = vrcp.f32 %v4290_v22 }
 0x3ce   : > { %4430 = vmatpush3.msra.mxu1 %v821_v16  ;;  %v2345_v16 = vpop.f32.mrf.mxu1 }
 0x3cf   : > { %4431 = vmatprep.subr.mxu1 %v820_v55  ;;  %4676 = vrcp.f32 %v2345_v16 }
 0x3d0   : > { %4432 = vmatpush3.msra.mxu1 %v820_v55  ;;  %v6335_v55 = vpop.f32.mrf.mxu1 }
 0x3d1   : > { %4433 = vmatprep.subr.mxu1 %v819_v52  ;;  %4678 = vrcp.f32 %v6335_v55 }
 0x3d2   : > { %4434 = vmatpush3.msra.mxu1 %v819_v52  ;;  %v6337_v52 = vpop.f32.mrf.mxu1 }
 0x3d3   : > { %4435 = vmatprep.subr.mxu1 %v818_v43  ;;  %4680 = vrcp.f32 %v6337_v52 }
 0x3d4   : > { %4436 = vmatpush3.msra.mxu1 %v818_v43 }
 0x3d5   : > { %4437 = vmatprep.subr.mxu1 %v817_v53 }
 0x3d6   : > { %4438 = vmatpush3.msra.mxu1 %v817_v53 }
 0x3d7   : > { %4439 = vmatprep.subr.mxu1 %v816_v31 }
 0x3d8   : > { %4440 = vmatpush3.msra.mxu1 %v816_v31 }
 0x3d9   : > { %4441 = vmatprep.subr.mxu1 %v815_v24 }
 0x3da   : > { %4442 = vmatpush3.msra.mxu1 %v815_v24 }
 0x3db   : > { %4443 = vmatprep.subr.mxu1 %v814_v62 }
 0x3dc   : > { %4444 = vmatpush3.msra.mxu1 %v814_v62 }
 0x3dd   : > { %4445 = vmatprep.subr.mxu1 %v813_v34 }
 0x3de   : > { %4446 = vmatpush3.msra.mxu1 %v813_v34 }
 0x3df   : > { %4447 = vmatprep.subr.mxu1 %v812_v49 }
 0x3e0   : > { %4448 = vmatpush3.msra.mxu1 %v812_v49 }
 0x3e1   : > { %4450 = vmatmul.mubr.f32.vlgmr.msra.gmra.mxu1 %v6103_v2  ;;  %4487 = vmatprep.subr.mxu1 %v859_v63  ;;  %v855_v2 = vmul.f32 %v5823_v11, %v530_v5  ;;  %v850_v11 = vmul.f32 %v5877_v41, %v524_v54  ;;  %v6266_v41 = vadd.f32 %v5727_v30, %v4953_v45  ;;  %v4724_v45 = vld [vmem:[%s6484_s3 + $0x68] sm:$0xff] }
 0x3e2   : > { %4488 = vmatpush3.msra.mxu1 %v859_v63  ;;  %4519 = vmatprep.mubr.f32.mxu1 %v6141_v29  ;;  %v890_v30 = vmul.f32 %v4723_v0, %v6271_v37  ;;  %v4726_v29 = vld [vmem:[%s6484_s3 + $0x58] sm:$0xff]  ;;  %v4675_v0 = vpop.eup %4674 }
 0x3e3   : > { %4489 = vmatprep.subr.mxu1 %v858_v20  ;;  %v891_v27 = vmul.f32 %v4722_v40, %v6266_v41  ;;  %v889_v14 = vmul.f32 %v4724_v45, %v6266_v41  ;;  %v885_v38 = vmul.f32 %v4728_v26, %v6266_v41  ;;  %v883_v46 = vmul.f32 %v4730_v57, %v6266_v41 }
 0x3e4   : > { %4490 = vmatpush3.msra.mxu1 %v858_v20  ;;  %v879_v48 = vmul.f32 %v4734_v6, %v6266_v41  ;;  %v877_v15 = vmul.f32 %v4736_v44, %v6266_v41  ;;  %v6379_v26 = vstv %s3354_s21 }
 0x3e5   : > { %4491 = vmatprep.subr.mxu1 %v857_v25 }
 0x3e6   : > { %4492 = vmatpush3.msra.mxu1 %v857_v25 }
 0x3e7   : > { %4493 = vmatprep.subr.mxu1 %v856_v36 }
 0x3e8   : > { %4494 = vmatpush3.msra.mxu1 %v856_v36  ;;  %v4677_v36 = vpop.eup %4676 }
 0x3e9   : > { %4495 = vmatprep.subr.mxu1 %v855_v2 }
 0x3ea   : > { %4496 = vmatpush3.msra.mxu1 %v855_v2 }
 0x3eb   : > { %4497 = vmatprep.subr.mxu1 %v854_v12 }
 0x3ec   : > { %4498 = vmatpush3.msra.mxu1 %v854_v12  ;;  %v3242_v12 = vmul.f32 %v4675_v0, %v4290_v22 }
 0x3ed   : > { %4499 = vmatprep.subr.mxu1 %v853_v13 }
 0x3ee   : > { %4500 = vmatpush3.msra.mxu1 %v853_v13 }
 0x3ef   : > { %4501 = vmatprep.subr.mxu1 %v852_v7 }
 0x3f0   : > { %4502 = vmatpush3.msra.mxu1 %v852_v7 }
 0x3f1   : > { %4503 = vmatprep.subr.mxu1 %v851_v19 }
 0x3f2   : > { %4504 = vmatpush3.msra.mxu1 %v851_v19  ;;  %v3241_v19 = vmul.f32 %v4677_v36, %v2345_v16 }
 0x3f3   : > { %4505 = vmatprep.subr.mxu1 %v850_v11 }
 0x3f4   : > { %4506 = vmatpush3.msra.mxu1 %v850_v11 }
 0x3f5   : > { %4507 = vmatprep.subr.mxu1 %v849_v17 }
 0x3f6   : > { %4508 = vmatpush3.msra.mxu1 %v849_v17 }
 0x3f7   : > { %4509 = vmatprep.subr.mxu1 %v848_v28 }
 0x3f8   : > { %4510 = vmatpush3.msra.mxu1 %v848_v28  ;;  %v6339_v43 = vpop.f32.mrf.mxu1  ;;  %v4416_v54 = vpop.f32.mrf.mxu0  ;;  %v3258_v28 = vsub.f32 2.0, %v3242_v12 }
 0x3f9   : > { %4511 = vmatprep.subr.mxu1 %v847_v50  ;;  %4682 = vrcp.f32 %v6339_v43 }
 0x3fa   : > { %4512 = vmatpush3.msra.mxu1 %v847_v50  ;;  %v6341_v53 = vpop.f32.mrf.mxu1  ;;  %v2640_v63 = vpop.f32.mrf.mxu0  ;;  %v3257_v50 = vsub.f32 2.0, %v3241_v19 }
 0x3fb   : > { %4513 = vmatprep.subr.mxu1 %v846_v61  ;;  %4684 = vrcp.f32 %v6341_v53 }
 0x3fc   : > { %4514 = vmatpush3.msra.mxu1 %v846_v61 }
 0x3fd   : > { %4515 = vmatprep.subr.mxu1 %v845_v3  ;;  %v6343_v31 = vpop.f32.mrf.mxu1 }
 0x3fe   : > { %4516 = vmatpush3.msra.mxu1 %v845_v3  ;;  %4686 = vrcp.f32 %v6343_v31 }
 0x3ff   : > { %4517 = vmatprep.subr.mxu1 %v844_v58  ;;  %v6345_v24 = vpop.f32.mrf.mxu1 }
 0x400   : > { %4518 = vmatpush3.msra.mxu1 %v844_v58  ;;  %v3273_v58 = vmul.f32 %v4677_v36, %v3257_v50  ;;  %4688 = vrcp.f32 %v6345_v24 }
 0x401   : > { %4520 = vmatmul.mubr.f32.vlgmr.msra.gmra.mxu1 %v6143_v33  ;;  %4557 = vmatprep.subr.mxu1 %v891_v27  ;;  %v887_v33 = vmul.f32 %v4726_v29, %v6266_v41 }
 0x402   : > { %4558 = vmatpush3.msra.mxu1 %v891_v27  ;;  %4589 = vmatprep.mubr.f32.mxu1 %v6180_v51  ;;  %v881_v51 = vmul.f32 %v4732_v56, %v6266_v41  ;;  %v3274_v41 = vmul.f32 %v4675_v0, %v3258_v28 }
 0x403   : > { %4559 = vmatprep.subr.mxu1 %v890_v30 }
 0x404   : > { %4560 = vmatpush3.msra.mxu1 %v890_v30 }
 0x405   : > { %4561 = vmatprep.subr.mxu1 %v889_v14 }
 0x406   : > { %4562 = vmatpush3.msra.mxu1 %v889_v14 }
 0x407   : > { %4563 = vmatprep.subr.mxu1 %v888_v8 }
 0x408   : > { %4564 = vmatpush3.msra.mxu1 %v888_v8 }
 0x409   : > { %4565 = vmatprep.subr.mxu1 %v887_v33 }
 0x40a   : > { %4566 = vmatpush3.msra.mxu1 %v887_v33 }
 0x40b   : > { %4567 = vmatprep.subr.mxu1 %v886_v60 }
 0x40c   : > { %4568 = vmatpush3.msra.mxu1 %v886_v60 }
 0x40d   : > { %4569 = vmatprep.subr.mxu1 %v885_v38 }
 0x40e   : > { %4570 = vmatpush3.msra.mxu1 %v885_v38 }
 0x40f   : > { %4571 = vmatprep.subr.mxu1 %v884_v39 }
 0x410   : > { %4572 = vmatpush3.msra.mxu1 %v884_v39 }
 0x411   : > { %4573 = vmatprep.subr.mxu1 %v883_v46 }
 0x412   : > { %4574 = vmatpush3.msra.mxu1 %v883_v46  ;;  %v4679_v46 = vpop.eup %4678 }
 0x413   : > { %4575 = vmatprep.subr.mxu1 %v882_v42  ;;  %v4681_v9 = vpop.eup %4680 }
 0x414   : > { %4576 = vmatpush3.msra.mxu1 %v882_v42  ;;  %v3244_v42 = vmul.f32 %v4679_v46, %v6335_v55  ;;  %v4683_v56 = vpop.eup %4682 }
 0x415   : > { %4577 = vmatprep.subr.mxu1 %v881_v51  ;;  %v4685_v10 = vpop.eup %4684  ;;  %v3246_v6 = vmul.f32 %v4683_v56, %v6339_v43 }
 0x416   : > { %4578 = vmatpush3.msra.mxu1 %v881_v51  ;;  %v3243_v51 = vmul.f32 %v4681_v9, %v6337_v52  ;;  %v3245_v59 = vmul.f32 %v4685_v10, %v6341_v53 }
 0x417   : > { %4579 = vmatprep.subr.mxu1 %v880_v23 }
 0x418   : > { %4580 = vmatpush3.msra.mxu1 %v880_v23  ;;  %v3260_v23 = vsub.f32 2.0, %v3244_v42  ;;  %v3261_v4 = vsub.f32 2.0, %v3245_v59 }
 0x419   : > { %4581 = vmatprep.subr.mxu1 %v879_v48 }
 0x41a   : > { %4582 = vmatpush3.msra.mxu1 %v879_v48  ;;  %v3259_v48 = vsub.f32 2.0, %v3243_v51  ;;  %v3276_v44 = vmul.f32 %v4679_v46, %v3260_v23  ;;  %v3277_v43 = vmul.f32 %v4685_v10, %v3261_v4 }
 0x41b   : > { %4583 = vmatprep.subr.mxu1 %v878_v21 }
 0x41c   : > { %4584 = vmatpush3.msra.mxu1 %v878_v21  ;;  %v3262_v21 = vsub.f32 2.0, %v3246_v6  ;;  %v3275_v22 = vmul.f32 %v4681_v9, %v3259_v48 }
 0x41d   : > { %4585 = vmatprep.subr.mxu1 %v877_v15 }
 0x41e   : > { %4586 = vmatpush3.msra.mxu1 %v877_v15 }
 0x41f   : > { %4587 = vmatprep.subr.mxu1 %v876_v1 }
 0x420   : > { %4588 = vmatpush3.msra.mxu1 %v876_v1 }
 0x421   : > { %4590 = vmatmul.mubr.f32.vlgmr.msra.gmra.mxu1 %v6185_v35 }
 0x438   : > { %v6347_v62 = vpop.f32.mrf.mxu1  ;;  %v4486_v20 = vpop.f32.mrf.mxu0 }
 0x439   : > { %4690 = vrcp.f32 %v6347_v62 }
 0x43a   : > { %v6349_v5 = vpop.f32.mrf.mxu1  ;;  %v2790_v13 = vpop.f32.mrf.mxu0 }
 0x43b   : > { %4692 = vrcp.f32 %v6349_v5 }
 0x43d   : > { %v6351_v35 = vpop.f32.mrf.mxu1 }
 0x43e   : > { %4694 = vrcp.f32 %v6351_v35 }
 0x43f   : > { %v6353_v34 = vpop.f32.mrf.mxu1 }
 0x440   : > { %4696 = vrcp.f32 %v6353_v34 }
 0x478   : > { %v6355_v49 = vpop.f32.mrf.mxu1  ;;  %v4556_v11 = vpop.f32.mrf.mxu0 }
 0x479   : > { %4698 = vrcp.f32 %v6355_v49 }
 0x47a   : > { %v6357_v40 = vpop.f32.mrf.mxu1  ;;  %v2940_v61 = vpop.f32.mrf.mxu0 }
 0x47b   : > { %4700 = vrcp.f32 %v6357_v40 }
 0x47d   : > { %v6359_v25 = vpop.f32.mrf.mxu1 }
 0x47e   : > { %4702 = vrcp.f32 %v6359_v25 }
 0x47f   : > { %v6361_v2 = vpop.f32.mrf.mxu1 }
 0x480   : > { %4704 = vrcp.f32 %v6361_v2 }
 0x481   : > { %v4381_v7 = vpop.f32.mrf.mxu1 }
 0x483   : > { %v2565_v17 = vpop.f32.mrf.mxu1 }
 0x484   : > { %4611 = vmatprep.mubr.msk.f32.mxu0 %vm942_vm1, %v2565_v17 }
 0x485   : > { %4612 = vmatmul.mubr.msk.f32.gmra.mxu0 %vm942_vm1, %v4381_v7  ;;  %v4687_v7 = vpop.eup %4686 }
 0x486   : > { %4614 = vmatprep.mubr.msk.f32.mxu0 %vm942_vm1, %v2640_v63  ;;  %v3278_v63 = vmul.f32 %v4683_v56, %v3262_v21  ;;  %v4689_v19 = vpop.eup %4688 }
 0x487   : > { %v4691_v17 = vpop.eup %4690  ;;  %v3247_v28 = vmul.f32 %v4689_v19, %v6345_v24 }
 0x488   : > { %v4693_v50 = vpop.eup %4692 }
 0x489   : > { %v4610_v3 = vpop.f32.mrf.mxu0  ;;  %4615 = vmatmul.mubr.msk.f32.gmra.mxu0 %vm942_vm1, %v4416_v54 }
 0x48a   : > { %v3290_v37 = vmul.f32 %v4610_v3, %v3274_v41  ;;  %v3250_v41 = vmul.f32 %v4691_v17, %v6347_v62  ;;  %v3263_v3 = vsub.f32 2.0, %v3247_v28 }
 0x48b   : > { %v3146_v27 = vpop.f32.mrf.mxu0 }
 0x48c   : > { %v3289_v30 = vmul.f32 %v3273_v58, %v3146_v27  ;;  %v3309_v45 = vsel %vm3305_vm2, %v3290_v37, 0.0  ;;  %v3249_v37 = vmul.f32 %v4693_v50, %v6349_v5  ;;  %v3266_v58 = vsub.f32 2.0, %v3250_v41 }
 0x48d   : > { %3310 = vadd.xlane.f32.xlu0 %v3309_v45 }
 0x48e   : > { %v3306_v14 = vsel %vm3305_vm2, %v3289_v30, 0.0  ;;  %v3265_v45 = vsub.f32 2.0, %v3249_v37 }
 0x48f   : > { %3307 = vadd.xlane.f32.xlu1 %v3306_v14 }
 0x490   : > { %v3281_v62 = vmul.f32 %v4693_v50, %v3265_v45 }
 0x4a1   : > { %v4451_v18 = vpop.f32.mrf.mxu1 }
 0x4a3   : > { %v2715_v8 = vpop.f32.mrf.mxu1 }
 0x4a4   : > { %4617 = vmatprep.mubr.msk.f32.mxu0 %vm942_vm1, %v2715_v8 }
 0x4a5   : > { %4618 = vmatmul.mubr.msk.f32.gmra.mxu0 %vm942_vm1, %v4451_v18  ;;  %v3279_v18 = vmul.f32 %v4689_v19, %v3263_v3 }
 0x4a6   : > { %4620 = vmatprep.mubr.msk.f32.mxu0 %vm942_vm1, %v2790_v13 }
 0x4a9   : > { %4621 = vmatmul.mubr.msk.f32.gmra.mxu0 %vm942_vm1, %v4486_v20 }
 0x4c1   : > { %v4521_v29 = vpop.f32.mrf.mxu1 }
 0x4c3   : > { %v2865_v33 = vpop.f32.mrf.mxu1 }
 0x4c4   : > { %4623 = vmatprep.mubr.msk.f32.mxu0 %vm942_vm1, %v2865_v33  ;;  %v3282_v33 = vmul.f32 %v4691_v17, %v3266_v58 }
 0x4c5   : > { %4624 = vmatmul.mubr.msk.f32.gmra.mxu0 %vm942_vm1, %v4521_v29 }
 0x4c6   : > { %4626 = vmatprep.mubr.msk.f32.mxu0 %vm942_vm1, %v2940_v61 }
 0x4c9   : > { %4627 = vmatmul.mubr.msk.f32.gmra.mxu0 %vm942_vm1, %v4556_v11  ;;  %v3248_v11 = vmul.f32 %v4687_v7, %v6343_v31 }
 0x4cb   : > { %v3264_v61 = vsub.f32 2.0, %v3248_v11 }
 0x4cd   : > { %v3280_v27 = vmul.f32 %v4687_v7, %v3264_v61 }
 0x4e1   : > { %v4591_v32 = vpop.f32.mrf.mxu1 }
 0x4e3   : > { %v3015_v60 = vpop.f32.mrf.mxu1 }
 0x4e4   : > { %4629 = vmatprep.mubr.msk.f32.mxu0 %vm942_vm1, %v3015_v60 }
 0x4e5   : > { %4630 = vmatmul.mubr.msk.f32.gmra.mxu0 %vm942_vm1, %v4591_v32 }
 0x516   : > { %v3311_v38 = vpop.xlane.xlu0 %3310 }
 0x517   : > { %v3357_v47 = vadd.f32 %v6379_v26, %v3311_v38 }
 0x518   : > { %v3308_v39 = vpop.xlane.xlu1 %3307 }
 0x519   : > { %3374 = vst.msk [vmem:[%s6386_s25 + $0x8] sm:$0xff] %vm3372_vm3, %v3357_v47  ;;  %v3356_v57 = vadd.f32 %v6379_v26, %v3308_v39 }
 0x51b   : > { %3373 = vst.msk [vmem:[%s6386_s25] sm:$0xff] %vm3372_vm3, %v3356_v57  ;;  %v4695_v57 = vpop.eup %4694 }
 0x51c   : > { %v4697_v46 = vpop.eup %4696  ;;  %v3252_v9 = vmul.f32 %v4695_v57, %v6351_v35 }
 0x51d   : > { %v4699_v42 = vpop.eup %4698  ;;  %v3251_v56 = vmul.f32 %v4697_v46, %v6353_v34 }
 0x51e   : > { %v4701_v51 = vpop.eup %4700  ;;  %v3268_v10 = vsub.f32 2.0, %v3252_v9  ;;  %v3254_v23 = vmul.f32 %v4699_v42, %v6355_v49 }
 0x51f   : > { %v3267_v6 = vsub.f32 2.0, %v3251_v56  ;;  %v3253_v48 = vmul.f32 %v4701_v51, %v6357_v40 }
 0x520   : > { %v3270_v59 = vsub.f32 2.0, %v3254_v23  ;;  %v3284_v21 = vmul.f32 %v4695_v57, %v3268_v10 }
 0x545   : > { %v4613_v15 = vpop.f32.mrf.mxu0 }
 0x546   : > { %v3292_v1 = vmul.f32 %v4613_v15, %v3276_v44  ;;  %v3269_v15 = vsub.f32 2.0, %v3253_v48 }
 0x547   : > { %v3156_v16 = vpop.f32.mrf.mxu0 }
 0x548   : > { %v3291_v54 = vmul.f32 %v3275_v22, %v3156_v16  ;;  %v3315_v55 = vsel %vm3305_vm2, %v3292_v1, 0.0  ;;  %v3283_v1 = vmul.f32 %v4697_v46, %v3267_v6  ;;  %v3285_v49 = vmul.f32 %v4701_v51, %v3269_v15 }
 0x549   : > { %3316 = vadd.xlane.f32.xlu0 %v3315_v55  ;;  %v4616_v52 = vpop.f32.mrf.mxu0 }
 0x54a   : > { %v3294_v0 = vmul.f32 %v4616_v52, %v3278_v63  ;;  %v3312_v20 = vsel %vm3305_vm2, %v3291_v54, 0.0  ;;  %v3286_v54 = vmul.f32 %v4699_v42, %v3270_v59 }
 0x54b   : > { %3313 = vadd.xlane.f32.xlu1 %v3312_v20  ;;  %v3166_v36 = vpop.f32.mrf.mxu0 }
 0x54c   : > { %v3293_v53 = vmul.f32 %v3277_v43, %v3166_v36  ;;  %v3321_v12 = vsel %vm3305_vm2, %v3294_v0, 0.0  ;;  %v4703_v43 = vpop.eup %4702 }
 0x54d   : > { %3322 = vadd.xlane.f32.xlu0 %v3321_v12  ;;  %v4705_v36 = vpop.eup %4704 }
 0x54e   : > { %v3318_v13 = vsel %vm3305_vm2, %v3293_v53, 0.0  ;;  %v3256_v53 = vmul.f32 %v4703_v43, %v6359_v25  ;;  %v3255_v12 = vmul.f32 %v4705_v36, %v6361_v2 }
 0x54f   : > { %3319 = vadd.xlane.f32.xlu1 %v3318_v13 }
 0x550   : > { %v3272_v13 = vsub.f32 2.0, %v3256_v53  ;;  %v3271_v7 = vsub.f32 2.0, %v3255_v12 }
 0x552   : > { %v3288_v19 = vmul.f32 %v4703_v43, %v3272_v13  ;;  %v3287_v28 = vmul.f32 %v4705_v36, %v3271_v7 }
 0x565   : > { %v4619_v30 = vpop.f32.mrf.mxu0 }
 0x566   : > { %v3296_v14 = vmul.f32 %v4619_v30, %v3280_v27 }
 0x567   : > { %v3176_v8 = vpop.f32.mrf.mxu0 }
 0x568   : > { %v3295_v29 = vmul.f32 %v3279_v18, %v3176_v8  ;;  %v3327_v31 = vsel %vm3305_vm2, %v3296_v14, 0.0 }
 0x569   : > { %3328 = vadd.xlane.f32.xlu0 %v3327_v31  ;;  %v4622_v24 = vpop.f32.mrf.mxu0 }
 0x56a   : > { %v3298_v32 = vmul.f32 %v4622_v24, %v3282_v33  ;;  %v3324_v60 = vsel %vm3305_vm2, %v3295_v29, 0.0 }
 0x56b   : > { %3325 = vadd.xlane.f32.xlu1 %v3324_v60  ;;  %v3186_v38 = vpop.f32.mrf.mxu0 }
 0x56c   : > { %v3297_v5 = vmul.f32 %v3281_v62, %v3186_v38  ;;  %v3333_v47 = vsel %vm3305_vm2, %v3298_v32, 0.0 }
 0x56d   : > { %3334 = vadd.xlane.f32.xlu0 %v3333_v47 }
 0x56e   : > { %v3330_v39 = vsel %vm3305_vm2, %v3297_v5, 0.0 }
 0x56f   : > { %3331 = vadd.xlane.f32.xlu1 %v3330_v39 }
 0x585   : > { %v4625_v44 = vpop.f32.mrf.mxu0 }
 0x586   : > { %v3300_v4 = vmul.f32 %v4625_v44, %v3284_v21 }
 0x587   : > { %v3196_v22 = vpop.f32.mrf.mxu0 }
 0x588   : > { %v3299_v16 = vmul.f32 %v3283_v1, %v3196_v22  ;;  %v3339_v35 = vsel %vm3305_vm2, %v3300_v4, 0.0 }
 0x589   : > { %3340 = vadd.xlane.f32.xlu0 %v3339_v35  ;;  %v4628_v34 = vpop.f32.mrf.mxu0 }
 0x58a   : > { %v3302_v55 = vmul.f32 %v4628_v34, %v3286_v54  ;;  %v3336_v63 = vsel %vm3305_vm2, %v3299_v16, 0.0 }
 0x58b   : > { %3337 = vadd.xlane.f32.xlu1 %v3336_v63  ;;  %v3206_v52 = vpop.f32.mrf.mxu0 }
 0x58c   : > { %v3301_v40 = vmul.f32 %v3285_v49, %v3206_v52  ;;  %v3345_v0 = vsel %vm3305_vm2, %v3302_v55, 0.0 }
 0x58d   : > { %3346 = vadd.xlane.f32.xlu0 %v3345_v0 }
 0x58e   : > { %v3342_v20 = vsel %vm3305_vm2, %v3301_v40, 0.0 }
 0x58f   : > { %3343 = vadd.xlane.f32.xlu1 %v3342_v20 }
 0x5a5   : > { %v4631_v11 = vpop.f32.mrf.mxu0 }
 0x5a6   : > { %v3304_v17 = vmul.f32 %v4631_v11, %v3288_v19 }
 0x5a7   : > { %v3216_v50 = vpop.f32.mrf.mxu0 }
 0x5a8   : > { %v3303_v61 = vmul.f32 %v3287_v28, %v3216_v50  ;;  %v3351_v41 = vsel %vm3305_vm2, %v3304_v17, 0.0 }
 0x5a9   : > { %3352 = vadd.xlane.f32.xlu0 %v3351_v41 }
 0x5aa   : > { %v3348_v3 = vsel %vm3305_vm2, %v3303_v61, 0.0 }
 0x5ab   : > { %3349 = vadd.xlane.f32.xlu1 %v3348_v3 }
 0x5d2   : > { %v3317_v25 = vpop.xlane.xlu0 %3316 }
 0x5d3   : > { %v3359_v2 = vadd.f32 %v6379_v26, %v3317_v25 }
 0x5d4   : > { %v3314_v37 = vpop.xlane.xlu1 %3313 }
 0x5d5   : > { %3376 = vst.msk [vmem:[%s6386_s25 + $0x18] sm:$0xff] %vm3372_vm3, %v3359_v2  ;;  %v3358_v58 = vadd.f32 %v6379_v26, %v3314_v37 }
 0x5d6   : > { %v3323_v27 = vpop.xlane.xlu0 %3322 }
 0x5d7   : > { %3375 = vst.msk [vmem:[%s6386_s25 + $0x10] sm:$0xff] %vm3372_vm3, %v3358_v58  ;;  %v3361_v30 = vadd.f32 %v6379_v26, %v3323_v27 }
 0x5d8   : > { %v3320_v45 = vpop.xlane.xlu1 %3319 }
 0x5d9   : > { %3378 = vst.msk [vmem:[%s6386_s25 + $0x28] sm:$0xff] %vm3372_vm3, %v3361_v30  ;;  %v3360_v14 = vadd.f32 %v6379_v26, %v3320_v45 }
 0x5db   : > { %3377 = vst.msk [vmem:[%s6386_s25 + $0x20] sm:$0xff] %vm3372_vm3, %v3360_v14 }
 0x5f2   : > { %v3329_v18 = vpop.xlane.xlu0 %3328 }
 0x5f3   : > { %v3363_v8 = vadd.f32 %v6379_v26, %v3329_v18 }
 0x5f4   : > { %v3326_v29 = vpop.xlane.xlu1 %3325 }
 0x5f5   : > { %3380 = vst.msk [vmem:[%s6386_s25 + $0x38] sm:$0xff] %vm3372_vm3, %v3363_v8  ;;  %v3362_v31 = vadd.f32 %v6379_v26, %v3326_v29 }
 0x5f6   : > { %v3335_v33 = vpop.xlane.xlu0 %3334 }
 0x5f7   : > { %3379 = vst.msk [vmem:[%s6386_s25 + $0x30] sm:$0xff] %vm3372_vm3, %v3362_v31  ;;  %v3365_v24 = vadd.f32 %v6379_v26, %v3335_v33 }
 0x5f8   : > { %v3332_v32 = vpop.xlane.xlu1 %3331 }
 0x5f9   : > { %3382 = vst.msk [vmem:[%s6386_s25 + $0x48] sm:$0xff] %vm3372_vm3, %v3365_v24  ;;  %v3364_v60 = vadd.f32 %v6379_v26, %v3332_v32 }
 0x5fb   : > { %3381 = vst.msk [vmem:[%s6386_s25 + $0x40] sm:$0xff] %vm3372_vm3, %v3364_v60 }
 0x612   : > { %v3341_v62 = vpop.xlane.xlu0 %3340 }
 0x613   : > { %v3367_v38 = vadd.f32 %v6379_v26, %v3341_v62 }
 0x614   : > { %v3338_v5 = vpop.xlane.xlu1 %3337 }
 0x615   : > { %3384 = vst.msk [vmem:[%s6386_s25 + $0x58] sm:$0xff] %vm3372_vm3, %v3367_v38  ;;  %v3366_v47 = vadd.f32 %v6379_v26, %v3338_v5 }
 0x616   : > { %v3347_v39 = vpop.xlane.xlu0 %3346 }
 0x617   : > { %3383 = vst.msk [vmem:[%s6386_s25 + $0x50] sm:$0xff] %vm3372_vm3, %v3366_v47  ;;  %v3369_v57 = vadd.f32 %v6379_v26, %v3347_v39 }
 0x618   : > { %v3344_v46 = vpop.xlane.xlu1 %3343 }
 0x619   : > { %3386 = vst.msk [vmem:[%s6386_s25 + $0x68] sm:$0xff] %vm3372_vm3, %v3369_v57  ;;  %v3368_v9 = vadd.f32 %v6379_v26, %v3344_v46 }
 0x61b   : > { %3385 = vst.msk [vmem:[%s6386_s25 + $0x60] sm:$0xff] %vm3372_vm3, %v3368_v9 }
 0x632   : > { %v3353_v42 = vpop.xlane.xlu0 %3352 }
 0x633   : > { %v3371_v56 = vadd.f32 %v6379_v26, %v3353_v42 }
 0x634   : > { %v3350_v51 = vpop.xlane.xlu1 %3349 }
 0x635   : > { %3388 = vst.msk [vmem:[%s6386_s25 + $0x78] sm:$0xff] %vm3372_vm3, %v3371_v56  ;;  %v3370_v10 = vadd.f32 %v6379_v26, %v3350_v51 }
 0x637   : > { %3387 = vst.msk [vmem:[%s6386_s25 + $0x70] sm:$0xff] %vm3372_vm3, %v3370_v10 }
 0x638 PF: > { %s19_s29 = sadd.s32 1, %s4744_s29  }
 0x639   : > { %p16_p4 = scmp.ge.s32.totalorder %s19_s29, 10  }
 0x63b   :  { %18 = sbr.rel (!%p16_p4) target bundleno = 2 (0x2), region = 82 }

</bundles_post_ra>
